<compile_context>
chip_gen: v7x
topology: tpu7x:2x2x1
jax: 0.10.0
libtpu: 0.0.40
codegen_flags: <defaults>
</compile_context>

<pallas_src>
import functools

import jax
import jax.numpy as jnp
from jax.experimental import pallas as pl
from jax.experimental.pallas import tpu as pltpu

EPS = 1e-5        # InstanceNorm2d eps
NSAMPLE = 8       # nsample for both SA layers
CPAD = 128        # channel padding (lane-dense)


# ---------------------------------------------------------------------------
# Fused (grouping + sa1 + sa2) Pallas kernel: one grid step = TB batch elems
# ---------------------------------------------------------------------------

def _h0_kernel(idx_ref, pts_ref, w_ref, b2_ref, o_ref, *, K, S, TB):
    KS = K * S
    C = CPAD
    inv_n = 1.0 / float(KS)

    # Loop-invariant iotas (hoisted out of the per-element loop).
    col = jax.lax.broadcasted_iota(jnp.int32, (KS, S), 1)     # one-hot columns
    lane = jax.lax.broadcasted_iota(jnp.int32, (S, C), 1)     # channel index

    # --- build the grouped sa1 input in-VMEM via an exact one-hot MXU gather
    # (bf16 one-hot: 0/1 exact, f32 accumulation -> gather is exact).
    ohs, xs = [], []
    for t in range(TB):
        pts = pts_ref[t]                                       # [S, 128] bf16
        oh = (col == idx_ref[t]).astype(jnp.bfloat16)          # [KS, S]
        ohs.append(oh)
        nbr = jnp.dot(oh, pts, preferred_element_type=jnp.float32)   # [KS, 128]
        # center xyz (channels 0:3 only), tiled over the K neighbors
        ctr = jnp.where(lane < 3, pts.astype(jnp.float32), 0.0)      # [S, 128]
        ctr_t = jnp.broadcast_to(ctr[None], (K, S, C)).reshape(KS, C)
        xs.append((nbr - ctr_t).astype(jnp.bfloat16))          # [rel_xyz|feat|0]
    x = xs[0] if TB == 1 else jnp.concatenate(xs, axis=0)      # [TB*KS, 128]

    def conv_in_relu(h, w):
        # 1x1 Conv2d (bias omitted on purpose: InstanceNorm2d affine=False
        # subtracts the per-channel mean over K*S, cancelling a constant bias
        # exactly), then two-pass InstanceNorm stats in f32, then ReLU.
        y = jnp.dot(h, w, preferred_element_type=jnp.float32)         # [TB*KS, C]
        y3 = y.reshape(TB, KS, C)
        mu = jnp.sum(y3, axis=1, keepdims=True) * inv_n                # [TB, 1, C]
        d = y3 - mu
        var = jnp.sum(d * d, axis=1, keepdims=True) * inv_n
        yn = d * jax.lax.rsqrt(var + EPS)
        return jnp.maximum(yn, 0.0).reshape(TB * KS, C).astype(jnp.bfloat16)

    h = conv_in_relu(x, w_ref[0])
    h = conv_in_relu(h, w_ref[1])
    h = conv_in_relu(h, w_ref[2])                               # [TB*KS, 128] bf16

    # sa1 output: max over the K neighbors (rows ordered (t, k, s)).
    f1 = jnp.max(h.reshape(TB, K, S, C), axis=1)                # [TB, S, 128] bf16

    # ------------------- sa2, fused (no HBM round trip) ---------------------
    # rel_xyz term: grouped x (channels 0:3) @ W2a (rows 3: are zero).
    y_xyz = jnp.dot(x, w_ref[3], preferred_element_type=jnp.float32)   # [TB*KS, C]
    # f1 term: (f1 @ W2b) gathered per neighbor with the SAME one-hot (bf16).
    yfs = []
    for t in range(TB):
        fw = jnp.dot(f1[t], w_ref[4], preferred_element_type=jnp.float32)  # [S, C]
        yfs.append(jnp.dot(ohs[t], fw.astype(jnp.bfloat16),
                           preferred_element_type=jnp.float32))            # [KS, C]
    y_feat = yfs[0] if TB == 1 else jnp.concatenate(yfs, axis=0)

    # Neighbor max first, bias after (max_k(y + b) == max_k(y) + b).
    y2 = (y_xyz + y_feat).reshape(TB, K, S, C)
    o_ref[...] = jnp.max(y2, axis=1) + b2_ref[...]              # [TB, S, 128] f32


def _h0_pallas(idx_flat, pts, wstack, b2, *, K, S, TB):
    B = pts.shape[0]
    KS = K * S
    G = B // TB
    C = CPAD

    # Rough per-step VMEM footprint (double-buffered operands + f32 temps).
    # TODO(synk): lane-dense idx layout (or SMEM/row-gather path) for large N;
    # the (KS, 1) int32 block lane-pads 128x in VMEM (harmless at these sizes).
    est = (2 * (TB * S * C * 2)              # pts (bf16)
           + 2 * (TB * KS * 128 * 4)         # idx (int32, lane-padded)
           + 2 * (TB * S * C * 4)            # out (f32)
           + 2 * (wstack.size * 2 + b2.size * 4)
           + 14 * TB * KS * C * 4            # conv / norm / sa2 f32 temporaries
           + 2 * TB * KS * S * 2)            # one-hot (bf16)
    vmem_limit = int(min(100 * 2**20, max(32 * 2**20, 2 * est)))

    kern = functools.partial(_h0_kernel, K=K, S=S, TB=TB)
    return pl.pallas_call(
        kern,
        out_shape=jax.ShapeDtypeStruct((B, S, C), jnp.float32),
        grid=(G,),
        in_specs=[
            pl.BlockSpec((TB, KS, 1), lambda g: (g, 0, 0)),     # neighbor ids
            pl.BlockSpec((TB, S, C), lambda g: (g, 0, 0)),      # per-point xyz|feat
            pl.BlockSpec(wstack.shape, lambda g: (0, 0, 0)),    # stacked weights
            pl.BlockSpec(b2.shape, lambda g: (0, 0)),           # sa2 bias
        ],
        out_specs=pl.BlockSpec((TB, S, C), lambda g: (g, 0, 0)),
        compiler_params=pltpu.CompilerParams(
            dimension_semantics=("parallel",),
            vmem_limit_bytes=vmem_limit),
    )(idx_flat, pts, wstack, b2)


# ---------------------------------------------------------------------------
# JAX glue: KNN (data-dependent), parameter prep, and the forward wrapper
# ---------------------------------------------------------------------------

def _knn_idx(xyz_cl, k):
    # TODO(synk): for large N, move the O(N^2) distance + top_k into Pallas.
    sq = jnp.sum(xyz_cl * xyz_cl, axis=-1)                        # [B, N]
    d = sq[:, :, None] + sq[:, None, :] - 2.0 * jnp.einsum(
        "bic,bjc->bij", xyz_cl, xyz_cl)
    _, idx = jax.lax.top_k(-d, k)                                 # [B, N, k]
    return idx


def _prep_params(params):
    """Pad / split / stack logical params into kernel operands (bf16 weights)."""
    w1, w2, w3 = params["sa1"]                  # [67,128], [128,128], [128,128]
    W2, b2 = params["sa2"]                      # [131,128], [1,128]
    c1 = w1.shape[0]
    w1p = jnp.zeros((CPAD, CPAD), jnp.float32).at[:c1].set(w1)
    w2a = jnp.zeros((CPAD, CPAD), jnp.float32).at[:3].set(W2[:3])
    w2b = W2[3:]                                # [128, 128]
    wstack = jnp.stack([w1p, w2, w3, w2a, w2b]).astype(jnp.bfloat16)
    return wstack, b2.astype(jnp.float32)


def _pick_tb(B, KS):
    """Batch elements per grid step: amortize per-step overhead / fill the MXU
    M dim at small N, but keep >= 2 grid steps when B >= 2 (both v7x cores)."""
    best = 1
    for tb in range(1, B + 1):
        if B % tb:
            continue
        if tb * KS > 4096:          # keep the fused block + f32 temps modest
            break
        if B >= 2 and B // tb < 2:
            continue
        best = tb
    return best


def h0net_forward(params, pc, feature):
    """pc: [B, 3, N], feature: [B, 64, N] -> feat_l2: [B, 128, N]."""
    B, _, N = pc.shape
    K = NSAMPLE
    S = N
    xyz_cl = jnp.transpose(pc, (0, 2, 1))         # [B, N, 3]
    feat_cl = jnp.transpose(feature, (0, 2, 1))   # [B, N, 64]

    # TODO(synk): furthest_point_sample with npoint == N is just an index
    # permutation; identity ordering replaces the non-deterministic CUDA FPS.
    idx = _knn_idx(xyz_cl, K)                     # [B, S, K]
    # Flat neighbor ids in neighbor-major order (row = k*S + s).
    idx_flat = jnp.transpose(idx, (0, 2, 1)).reshape(B, K * S, 1).astype(jnp.int32)

    # Lane-dense per-point operand [xyz(3) | feat(64) | 0] (bf16).  The 8x
    # grouped tensor never touches HBM: grouping happens in-kernel.
    pts = jnp.concatenate([xyz_cl, feat_cl], axis=-1)             # [B, S, 67]
    pts = jnp.pad(pts, ((0, 0), (0, 0), (0, CPAD - pts.shape[-1])))
    pts = pts.astype(jnp.bfloat16)

    wstack, b2 = _prep_params(params)
    TB = _pick_tb(B, K * S)
    out = _h0_pallas(idx_flat, pts, wstack, b2, K=K, S=S, TB=TB)  # [B, S, 128]
    return jnp.transpose(out, (0, 2, 1))          # [B, 128, N]


def init_params(key):
    # Deterministic synthetic parameters.  PyTorch Conv2d weight [Cout,Cin,1,1]
    # is stored transposed as [Cin, Cout].  sa1 conv biases are omitted: they
    # are provably cancelled by InstanceNorm's mean subtraction (affine=False).
    ks = jax.random.split(key, 5)

    def w(k, cin, cout):
        return 0.1 * jax.random.normal(k, (cin, cout), jnp.float32)

    sa1 = (w(ks[0], 67, 128), w(ks[1], 128, 128), w(ks[2], 128, 128))
    sa2 = (w(ks[3], 131, 128),
           0.01 * jax.random.normal(ks[4], (1, 128), jnp.float32))
    return {"sa1": sa1, "sa2": sa2}


if __name__ == "__main__":
    key = jax.random.PRNGKey(0)
    k_par, k_pc, k_fe = jax.random.split(key, 3)

    npoint = 64                 # H0Net(npoint, ...) -> SA layers use npoint // 4
    B = 2
    N = npoint // 4             # the cloud H0Net operates on (already /4 sampled)

    pc = jax.random.normal(k_pc, (B, 3, N), jnp.float32)
    feature = jax.random.normal(k_fe, (B, 64, N), jnp.float32)
    params = init_params(k_par)

    out = h0net_forward(params, pc, feature)
    jax.block_until_ready(out)
    assert out.shape == (B, 128, N), out.shape
    assert bool(jnp.all(jnp.isfinite(out)))
    print("KERNEL_OK")
</pallas_src>

<mosaic_0001>
module attributes {stable_mosaic.version = 11 : i64} {
  func.func @_h0_kernel(%arg0: i32, %arg1: memref<1x128x1xi32, #tpu.memory_space<vmem>>, %arg2: memref<1x16x128xbf16, #tpu.memory_space<vmem>>, %arg3: memref<5x128x128xbf16, #tpu.memory_space<vmem>>, %arg4: memref<1x128xf32, #tpu.memory_space<vmem>>, %arg5: memref<1x16x128xf32, #tpu.memory_space<vmem>>) attributes {dimension_semantics = [#tpu.dimension_semantics<parallel>], iteration_bounds = array<i64: 2>, scalar_prefetch = 0 : i64, scratch_operands = 0 : i64, tpu.core_type = #tpu.core_type<tc>, window_params = [{transform_indices = @transform_0, window_bounds = array<i64: 1, 128, 1>}, {transform_indices = @transform_1, window_bounds = array<i64: 1, 16, 128>}, {pipeline_mode = #tpu.pipeline_mode<synchronous>, transform_indices = @transform_2, window_bounds = array<i64: 5, 128, 128>}, {pipeline_mode = #tpu.pipeline_mode<synchronous>, transform_indices = @transform_3, window_bounds = array<i64: 1, 128>}, {transform_indices = @transform_4, window_bounds = array<i64: 1, 16, 128>}]} {
    %0 = tpu.iota {dimensions = array<i32: 1>} : vector<128x16xi32>
    %1 = tpu.iota {dimensions = array<i32: 1>} : vector<16x128xi32>
    %c0 = arith.constant 0 : index
    %c0_0 = arith.constant 0 : index
    %c0_1 = arith.constant 0 : index
    %2 = vector.load %arg2[%c0, %c0_0, %c0_1] : memref<1x16x128xbf16, #tpu.memory_space<vmem>>, vector<1x16x128xbf16>
    %3 = vector.shape_cast %2 : vector<1x16x128xbf16> to vector<16x128xbf16>
    %c0_2 = arith.constant 0 : index
    %c0_3 = arith.constant 0 : index
    %c0_4 = arith.constant 0 : index
    %4 = vector.load %arg1[%c0_2, %c0_3, %c0_4] : memref<1x128x1xi32, #tpu.memory_space<vmem>>, vector<1x128x1xi32>
    %5 = vector.shape_cast %4 : vector<1x128x1xi32> to vector<128x1xi32>
    %6 = vector.broadcast %5 : vector<128x1xi32> to vector<128x16xi32>
    %7 = arith.cmpi eq, %0, %6 : vector<128x16xi32>
    %8 = arith.extui %7 : vector<128x16xi1> to vector<128x16xi32>
    %9 = arith.sitofp %8 : vector<128x16xi32> to vector<128x16xf32>
    %10 = arith.truncf %9 : vector<128x16xf32> to vector<128x16xbf16>
    %cst = arith.constant dense<0.000000e+00> : vector<128x128xf32>
    %11 = tpu.matmul %10, %3, %cst {dimension_numbers = #tpu.dot_dimension_numbers<[1], [0], [0], [1], [0, 0, 1, 1], [], []>} : vector<128x16xbf16>, vector<16x128xbf16>, vector<128x128xf32> -> vector<128x128xf32>
    %c3_i32 = arith.constant 3 : i32
    %12 = vector.broadcast %c3_i32 : i32 to vector<16x128xi32>
    %13 = arith.cmpi slt, %1, %12 : vector<16x128xi32>
    %14 = arith.extf %3 : vector<16x128xbf16> to vector<16x128xf32>
    %cst_5 = arith.constant 0.000000e+00 : f32
    %15 = vector.broadcast %cst_5 : f32 to vector<16x128xf32>
    %16 = arith.select %13, %14, %15 : vector<16x128xi1>, vector<16x128xf32>
    %17 = vector.shape_cast %16 : vector<16x128xf32> to vector<1x16x128xf32>
    %18 = vector.shape_cast %17 : vector<1x16x128xf32> to vector<1x16x128xf32>
    %19 = vector.broadcast %18 : vector<1x16x128xf32> to vector<8x16x128xf32>
    %20 = vector.shape_cast %19 : vector<8x16x128xf32> to vector<128x128xf32>
    %21 = arith.subf %11, %20 : vector<128x128xf32>
    %22 = arith.truncf %21 : vector<128x128xf32> to vector<128x128xbf16>
    %c0_6 = arith.constant 0 : index
    %c0_7 = arith.constant 0 : index
    %c0_8 = arith.constant 0 : index
    %23 = vector.load %arg3[%c0_6, %c0_7, %c0_8] : memref<5x128x128xbf16, #tpu.memory_space<vmem>>, vector<1x128x128xbf16>
    %24 = vector.shape_cast %23 : vector<1x128x128xbf16> to vector<128x128xbf16>
    %cst_9 = arith.constant dense<0.000000e+00> : vector<128x128xf32>
    %25 = tpu.matmul %22, %24, %cst_9 {dimension_numbers = #tpu.dot_dimension_numbers<[1], [0], [0], [1], [0, 0, 1, 1], [], []>} : vector<128x128xbf16>, vector<128x128xbf16>, vector<128x128xf32> -> vector<128x128xf32>
    %26 = vector.shape_cast %25 : vector<128x128xf32> to vector<1x128x128xf32>
    %cst_10 = arith.constant dense<0.000000e+00> : vector<1x128xf32>
    %27 = vector.multi_reduction <add>, %26, %cst_10 [1] : vector<1x128x128xf32> to vector<1x128xf32>
    %28 = vector.shape_cast %27 : vector<1x128xf32> to vector<1x1x128xf32>
    %cst_11 = arith.constant 7.812500e-03 : f32
    %29 = vector.broadcast %cst_11 : f32 to vector<1x1x128xf32>
    %30 = arith.mulf %28, %29 : vector<1x1x128xf32>
    %31 = vector.broadcast %30 : vector<1x1x128xf32> to vector<1x128x128xf32>
    %32 = arith.subf %26, %31 : vector<1x128x128xf32>
    %33 = arith.mulf %32, %32 : vector<1x128x128xf32>
    %cst_12 = arith.constant dense<0.000000e+00> : vector<1x128xf32>
    %34 = vector.multi_reduction <add>, %33, %cst_12 [1] : vector<1x128x128xf32> to vector<1x128xf32>
    %35 = vector.shape_cast %34 : vector<1x128xf32> to vector<1x1x128xf32>
    %cst_13 = arith.constant 7.812500e-03 : f32
    %36 = vector.broadcast %cst_13 : f32 to vector<1x1x128xf32>
    %37 = arith.mulf %35, %36 : vector<1x1x128xf32>
    %cst_14 = arith.constant 9.99999974E-6 : f32
    %38 = vector.broadcast %cst_14 : f32 to vector<1x1x128xf32>
    %39 = arith.addf %37, %38 : vector<1x1x128xf32>
    %40 = math.rsqrt %39 : vector<1x1x128xf32>
    %41 = vector.broadcast %40 : vector<1x1x128xf32> to vector<1x128x128xf32>
    %42 = arith.mulf %32, %41 : vector<1x128x128xf32>
    %cst_15 = arith.constant 0.000000e+00 : f32
    %43 = vector.broadcast %cst_15 : f32 to vector<1x128x128xf32>
    %44 = arith.maximumf %42, %43 : vector<1x128x128xf32>
    %45 = vector.shape_cast %44 : vector<1x128x128xf32> to vector<128x128xf32>
    %46 = arith.truncf %45 : vector<128x128xf32> to vector<128x128xbf16>
    %c1 = arith.constant 1 : index
    %c0_16 = arith.constant 0 : index
    %c0_17 = arith.constant 0 : index
    %47 = vector.load %arg3[%c1, %c0_16, %c0_17] : memref<5x128x128xbf16, #tpu.memory_space<vmem>>, vector<1x128x128xbf16>
    %48 = vector.shape_cast %47 : vector<1x128x128xbf16> to vector<128x128xbf16>
    %cst_18 = arith.constant dense<0.000000e+00> : vector<128x128xf32>
    %49 = tpu.matmul %46, %48, %cst_18 {dimension_numbers = #tpu.dot_dimension_numbers<[1], [0], [0], [1], [0, 0, 1, 1], [], []>} : vector<128x128xbf16>, vector<128x128xbf16>, vector<128x128xf32> -> vector<128x128xf32>
    %50 = vector.shape_cast %49 : vector<128x128xf32> to vector<1x128x128xf32>
    %cst_19 = arith.constant dense<0.000000e+00> : vector<1x128xf32>
    %51 = vector.multi_reduction <add>, %50, %cst_19 [1] : vector<1x128x128xf32> to vector<1x128xf32>
    %52 = vector.shape_cast %51 : vector<1x128xf32> to vector<1x1x128xf32>
    %cst_20 = arith.constant 7.812500e-03 : f32
    %53 = vector.broadcast %cst_20 : f32 to vector<1x1x128xf32>
    %54 = arith.mulf %52, %53 : vector<1x1x128xf32>
    %55 = vector.broadcast %54 : vector<1x1x128xf32> to vector<1x128x128xf32>
    %56 = arith.subf %50, %55 : vector<1x128x128xf32>
    %57 = arith.mulf %56, %56 : vector<1x128x128xf32>
    %cst_21 = arith.constant dense<0.000000e+00> : vector<1x128xf32>
    %58 = vector.multi_reduction <add>, %57, %cst_21 [1] : vector<1x128x128xf32> to vector<1x128xf32>
    %59 = vector.shape_cast %58 : vector<1x128xf32> to vector<1x1x128xf32>
    %cst_22 = arith.constant 7.812500e-03 : f32
    %60 = vector.broadcast %cst_22 : f32 to vector<1x1x128xf32>
    %61 = arith.mulf %59, %60 : vector<1x1x128xf32>
    %cst_23 = arith.constant 9.99999974E-6 : f32
    %62 = vector.broadcast %cst_23 : f32 to vector<1x1x128xf32>
    %63 = arith.addf %61, %62 : vector<1x1x128xf32>
    %64 = math.rsqrt %63 : vector<1x1x128xf32>
    %65 = vector.broadcast %64 : vector<1x1x128xf32> to vector<1x128x128xf32>
    %66 = arith.mulf %56, %65 : vector<1x128x128xf32>
    %cst_24 = arith.constant 0.000000e+00 : f32
    %67 = vector.broadcast %cst_24 : f32 to vector<1x128x128xf32>
    %68 = arith.maximumf %66, %67 : vector<1x128x128xf32>
    %69 = vector.shape_cast %68 : vector<1x128x128xf32> to vector<128x128xf32>
    %70 = arith.truncf %69 : vector<128x128xf32> to vector<128x128xbf16>
    %c2 = arith.constant 2 : index
    %c0_25 = arith.constant 0 : index
    %c0_26 = arith.constant 0 : index
    %71 = vector.load %arg3[%c2, %c0_25, %c0_26] : memref<5x128x128xbf16, #tpu.memory_space<vmem>>, vector<1x128x128xbf16>
    %72 = vector.shape_cast %71 : vector<1x128x128xbf16> to vector<128x128xbf16>
    %cst_27 = arith.constant dense<0.000000e+00> : vector<128x128xf32>
    %73 = tpu.matmul %70, %72, %cst_27 {dimension_numbers = #tpu.dot_dimension_numbers<[1], [0], [0], [1], [0, 0, 1, 1], [], []>} : vector<128x128xbf16>, vector<128x128xbf16>, vector<128x128xf32> -> vector<128x128xf32>
    %74 = vector.shape_cast %73 : vector<128x128xf32> to vector<1x128x128xf32>
    %cst_28 = arith.constant dense<0.000000e+00> : vector<1x128xf32>
    %75 = vector.multi_reduction <add>, %74, %cst_28 [1] : vector<1x128x128xf32> to vector<1x128xf32>
    %76 = vector.shape_cast %75 : vector<1x128xf32> to vector<1x1x128xf32>
    %cst_29 = arith.constant 7.812500e-03 : f32
    %77 = vector.broadcast %cst_29 : f32 to vector<1x1x128xf32>
    %78 = arith.mulf %76, %77 : vector<1x1x128xf32>
    %79 = vector.broadcast %78 : vector<1x1x128xf32> to vector<1x128x128xf32>
    %80 = arith.subf %74, %79 : vector<1x128x128xf32>
    %81 = arith.mulf %80, %80 : vector<1x128x128xf32>
    %cst_30 = arith.constant dense<0.000000e+00> : vector<1x128xf32>
    %82 = vector.multi_reduction <add>, %81, %cst_30 [1] : vector<1x128x128xf32> to vector<1x128xf32>
    %83 = vector.shape_cast %82 : vector<1x128xf32> to vector<1x1x128xf32>
    %cst_31 = arith.constant 7.812500e-03 : f32
    %84 = vector.broadcast %cst_31 : f32 to vector<1x1x128xf32>
    %85 = arith.mulf %83, %84 : vector<1x1x128xf32>
    %cst_32 = arith.constant 9.99999974E-6 : f32
    %86 = vector.broadcast %cst_32 : f32 to vector<1x1x128xf32>
    %87 = arith.addf %85, %86 : vector<1x1x128xf32>
    %88 = math.rsqrt %87 : vector<1x1x128xf32>
    %89 = vector.broadcast %88 : vector<1x1x128xf32> to vector<1x128x128xf32>
    %90 = arith.mulf %80, %89 : vector<1x128x128xf32>
    %cst_33 = arith.constant 0.000000e+00 : f32
    %91 = vector.broadcast %cst_33 : f32 to vector<1x128x128xf32>
    %92 = arith.maximumf %90, %91 : vector<1x128x128xf32>
    %93 = vector.shape_cast %92 : vector<1x128x128xf32> to vector<128x128xf32>
    %94 = arith.truncf %93 : vector<128x128xf32> to vector<128x128xbf16>
    %95 = vector.shape_cast %94 : vector<128x128xbf16> to vector<1x8x16x128xbf16>
    %cst_34 = arith.constant dense<0xFF80> : vector<1x16x128xbf16>
    %96 = vector.multi_reduction <maximumf>, %95, %cst_34 [1] : vector<1x8x16x128xbf16> to vector<1x16x128xbf16>
    %c3 = arith.constant 3 : index
    %c0_35 = arith.constant 0 : index
    %c0_36 = arith.constant 0 : index
    %97 = vector.load %arg3[%c3, %c0_35, %c0_36] : memref<5x128x128xbf16, #tpu.memory_space<vmem>>, vector<1x128x128xbf16>
    %98 = vector.shape_cast %97 : vector<1x128x128xbf16> to vector<128x128xbf16>
    %cst_37 = arith.constant dense<0.000000e+00> : vector<128x128xf32>
    %99 = tpu.matmul %22, %98, %cst_37 {dimension_numbers = #tpu.dot_dimension_numbers<[1], [0], [0], [1], [0, 0, 1, 1], [], []>} : vector<128x128xbf16>, vector<128x128xbf16>, vector<128x128xf32> -> vector<128x128xf32>
    %100 = vector.shape_cast %96 : vector<1x16x128xbf16> to vector<16x128xbf16>
    %c4 = arith.constant 4 : index
    %c0_38 = arith.constant 0 : index
    %c0_39 = arith.constant 0 : index
    %101 = vector.load %arg3[%c4, %c0_38, %c0_39] : memref<5x128x128xbf16, #tpu.memory_space<vmem>>, vector<1x128x128xbf16>
    %102 = vector.shape_cast %101 : vector<1x128x128xbf16> to vector<128x128xbf16>
    %cst_40 = arith.constant dense<0.000000e+00> : vector<16x128xf32>
    %103 = tpu.matmul %100, %102, %cst_40 {dimension_numbers = #tpu.dot_dimension_numbers<[1], [0], [0], [1], [0, 0, 1, 1], [], []>} : vector<16x128xbf16>, vector<128x128xbf16>, vector<16x128xf32> -> vector<16x128xf32>
    %104 = arith.truncf %103 : vector<16x128xf32> to vector<16x128xbf16>
    %cst_41 = arith.constant dense<0.000000e+00> : vector<128x128xf32>
    %105 = tpu.matmul %10, %104, %cst_41 {dimension_numbers = #tpu.dot_dimension_numbers<[1], [0], [0], [1], [0, 0, 1, 1], [], []>} : vector<128x16xbf16>, vector<16x128xbf16>, vector<128x128xf32> -> vector<128x128xf32>
    %106 = arith.addf %99, %105 : vector<128x128xf32>
    %107 = vector.shape_cast %106 : vector<128x128xf32> to vector<1x8x16x128xf32>
    %cst_42 = arith.constant dense<0xFF800000> : vector<1x16x128xf32>
    %108 = vector.multi_reduction <maximumf>, %107, %cst_42 [1] : vector<1x8x16x128xf32> to vector<1x16x128xf32>
    %c0_43 = arith.constant 0 : index
    %c0_44 = arith.constant 0 : index
    %109 = vector.load %arg4[%c0_43, %c0_44] : memref<1x128xf32, #tpu.memory_space<vmem>>, vector<1x128xf32>
    %110 = vector.shape_cast %109 : vector<1x128xf32> to vector<1x1x128xf32>
    %111 = vector.broadcast %110 : vector<1x1x128xf32> to vector<1x16x128xf32>
    %112 = arith.addf %108, %111 : vector<1x16x128xf32>
    %c0_45 = arith.constant 0 : index
    %c0_46 = arith.constant 0 : index
    %c0_47 = arith.constant 0 : index
    %113 = vector.load %arg5[%c0_45, %c0_46, %c0_47] : memref<1x16x128xf32, #tpu.memory_space<vmem>>, vector<1x16x128xf32>
    tpu.vector_store %arg5[%c0_45, %c0_46, %c0_47], %112 {strides = array<i32>} : memref<1x16x128xf32, #tpu.memory_space<vmem>>, vector<1x16x128xf32>,
    return
  }
  func.func @transform_0(%arg0: i32) -> (i32, i32, i32) {
    %c0_i32 = arith.constant 0 : i32
    %c0_i32_0 = arith.constant 0 : i32
    %c0_i32_1 = arith.constant 0 : i32
    return %arg0, %c0_i32, %c0_i32_0 : i32, i32, i32
  }
  func.func @transform_1(%arg0: i32) -> (i32, i32, i32) {
    %c0_i32 = arith.constant 0 : i32
    %c0_i32_0 = arith.constant 0 : i32
    %c0_i32_1 = arith.constant 0 : i32
    return %arg0, %c0_i32, %c0_i32_0 : i32, i32, i32
  }
  func.func @transform_2(%arg0: i32) -> (i32, i32, i32) {
    %c0_i32 = arith.constant 0 : i32
    %c0_i32_0 = arith.constant 0 : i32
    %c0_i32_1 = arith.constant 0 : i32
    %c0_i32_2 = arith.constant 0 : i32
    return %c0_i32, %c0_i32_0, %c0_i32_1 : i32, i32, i32
  }
  func.func @transform_3(%arg0: i32) -> (i32, i32) {
    %c0_i32 = arith.constant 0 : i32
    %c0_i32_0 = arith.constant 0 : i32
    %c0_i32_1 = arith.constant 0 : i32
    return %c0_i32, %c0_i32_0 : i32, i32
  }
  func.func @transform_4(%arg0: i32) -> (i32, i32, i32) {
    %c0_i32 = arith.constant 0 : i32
    %c0_i32_0 = arith.constant 0 : i32
    %c0_i32_1 = arith.constant 0 : i32
    return %arg0, %c0_i32, %c0_i32_0 : i32, i32, i32
  }
}

</mosaic_0001>

<bundles_post_ra>
// kernel: tpu_custom_call.1
= control target key start
LH: loop header
LB: loop body
LE: loop exit
PB: predicated region body
PF: predicated region fallthrough
CT: control target
= control target key end

     0   :  { %9 = vsyncpa [#allocation3], 0  ;;  %s2972_s0 = inlined_call_operand.vmem [shape: s32[2,128,1], index: 0, kind: input, shape index: {}]   ;;  %s2973_s1 = inlined_call_operand.vmem [shape: bf16[2,16,128], index: 1, kind: input, shape index: {}]   ;;  %s2974_s2 = inlined_call_operand.hbm [shape: bf16[5,128,128], index: 2, kind: input, shape index: {}]   ;;  %s2975_s3 = inlined_call_operand.vmem [shape: f32[1,128], index: 3, kind: input, shape index: {}]   ;;  %s2976_s4 = inlined_call_operand.hbm [shape: f32[2,16,128], index: 4, kind: output, shape index: {}]  }
   0x1   :  { %10 = vsyncpa [#allocation4], 0 }
   0x2   :  { %12 = vsyncpa [#allocation4 + $0x1], 0  ;;  %s2487_s15 = smov 0   ;;  %s2489_s16 = smov 0  }
   0x3   :  { %s2491_s17 = smov 0   ;;  %s2493_s18 = smov 0  }
   0x4 LB: > { %s2508_s19 = sadd.s32 4294967295, %s2451_s18   ;;  %s1850_s20 = sadd.s32 4294967294, %s2451_s18   ;;  %s2451_s18 = sphi %s2493_s18, %s3002_s18   ;;  %s2447_s17 = sphi %s2491_s17, %s3001_s17   ;;  %s2443_s16 = sphi %s2489_s16, %s3000_s16   ;;  %s2439_s15 = sphi %s2487_s15, %s2999_s15  }
   0x5   : > { %s2512_s21 = sadd.s32 1, %s2451_s18   ;;  %s119_s22 = sadd.s32 1, %s2447_s17 }
   0x6   : > { %s116_s23 = ssub.s32 %s2451_s18, %s2512_s21  ;;  %p129_p0 = scmp.ne.s32.totalorder %s2447_s17, %s2443_s16 }
   0x7   : > { %p117_p1 = scmp.eq.s32.totalorder %s116_s23, 0  ;;  %p130_p2 = scmp.eq.s32.totalorder %s2508_s19, 1 }
   0x8   : > { %p135_p3 = scmp.ne.s32.totalorder %s2443_s16, %s2439_s15  ;;  %p136_p4 = scmp.eq.s32.totalorder %s1850_s20, 1 }
   0x9   : > { %s2523_s24 = scalar_select %p117_p1, %s2447_s17, %s119_s22  }
   0xa   : > { %p2525_p5 = por %p130_p2, %p129_p0  ;;  %p2529_p6 = por %p136_p4, %p135_p3 }
   0xb   : > { %p1851_p7 = scmp.ge.s32.totalorder %s2451_s18, 1  ;;  %p143_p8 = scmp.lt.s32.totalorder %s2451_s18, 3 }
   0xc   : > { %s2980_s25 = scalar_select %p2525_p5, 1, 0 }
   0xd   : > { %s2981_s26 = scalar_select %p2529_p6, 1, 0 }
   0xe   : > { %p2977_p9 = scmp.eq.s32.totalorder %s2508_s19, 0  ;;  %p2536_p10 = pnand %p1851_p7, %p143_p8 }
   0xf   : > { %s2453_s28 = smov [#allocation2]   ;;  %s2357_s7 = scalar_lea.hbm %s2974_s2, 5120 }
  0x10   : > { %s2982_s27 = scalar_select %p2536_p10, 1, 0 }
  0x11   : > { %s155_s29 = sshll.u32 %s2453_s28, 4  ;;  %p2256_p11 = pneg %p2536_p10  ;;  %s156_s29 = int_to_ptr.vmem [resolvable:$true] %s155_s29 }
  0x12   : > { %p2358_p13 = scmp.ne.s32.totalorder %s2974_s2, %s2357_s7  ;;  %p2364_p3 = scmp.lt.u32.totalorder %s2357_s7, %s2974_s2 }
  0x13   : > { %p2544_p12 = pnand %p2977_p9, %p2256_p11 }
  0x15   : > { %p2359_p0 = pneg %p2544_p12 }
  0x17   : > { %p2360_p1 = pnand %p2359_p0, %p2358_p13 }
  0x19   : > { %p2361_p2 = pneg %p2360_p1 }
  0x1b   : > { %p2366_p4 = pnand %p2364_p3, %p2361_p2 }
  0x1d   : > { %2369 = shalt.err (!%p2366_p4)
}
  0x1e   : > { %s2370_s12 = scalar_lea.vmem %s156_s29, 5120  ;;  %p2378_p9 = scmp.lt.s32.totalorder %s156_s29, %s156_s29 }
  0x1f   : > { %p2371_p7 = scmp.ne.s32.totalorder %s156_s29, %s2370_s12  ;;  %p2379_p6 = scmp.lt.s32.totalorder %s2370_s12, %s2370_s12 }
  0x21   : > { %p2373_p8 = pnand %p2371_p7, %p2359_p0  ;;  %p2380_p5 = por %p2379_p6, %p2378_p9 }
  0x23   : > { %p2374_p11 = pneg %p2373_p8 }
  0x25   : > { %p2381_p10 = pnand %p2380_p5, %p2374_p11 }
  0x27   : > { %2384 = shalt.err (!%p2381_p10)
}
  0x28   : > { %s2454_s13 = smov 64   ;;  %s2455_s14 = smov 4  }
  0x29   : > { %2259 = dma.hbm_to_vmem [thread:$0]  (!%p2544_p12), %s2974_s2, 5120, %s156_s29, [#allocation3], %s2454_s13, %s2454_s13, %s2455_s14  }
  0x2a   : > { %p2984_p13 = scmp.ne.s32.totalorder %s2982_s27, 0 }
  0x2c   : > { %190 = sbr.rel (%p2984_p13) target bundleno = 1909 (0x775), region = 36 }
  0x33   : > { %p2985_p1 = scmp.eq.s32.totalorder %s2508_s19, 0 }
  0x35   : > { %2430 = dma.done.wait (%p2985_p1), [#allocation3], 5120   ;;  %p2986_p0 = pmov %p2985_p1 }
  0x36   : > { %p221_p5 = scmp.lt.s32.totalorder %s2508_s19, 1  ;;  %v2456_v0 = vmov 0   ;;  %v2310_v18 = vld [vmem:[#allocation2] sm:$0xff]   ;;  %v2311_v19 = vld [vmem:[#allocation2 + $0x8] sm:$0xff]   ;;  %v2312_v20 = vld [vmem:[#allocation2 + $0x10] sm:$0xff]   ;;  %v232_v24 = vlaneseq  ;;  %vm362_vm4 = vcmask 130048  }
  0x37   : > { %2432 = vsyncadd (%p2986_p0), [#allocation3], 4294962176  ;;  %2308 = vset.pattern.permute.xlu1 %v2456_v0  ;;  %2307 = vset.pattern.permute.xlu0 %v2456_v0  ;;  %v2313_v21 = vld [vmem:[#allocation2 + $0x18] sm:$0xff]   ;;  %v2314_v22 = vld [vmem:[#allocation2 + $0x20] sm:$0xff]   ;;  %v2457_v30 = vmov 0.0   ;;  %s218_s9 = sand.u32 1, %s2443_s16  }
  0x38   : > { %s222_s23 = scalar_select %p221_p5, %s2508_s19, 1  ;;  %2052 = vmatprep.subr.bf16.mxu1 %v2310_v18  ;;  %v2315_v23 = vld [vmem:[#allocation2 + $0x28] sm:$0xff]   ;;  %v2600_v25 = vand.u32 127, %v232_v24 }
  0x39   : > { %2053 = vmatpush3.bf16.msra.mxu1 %v2310_v18  ;;  %s1856_s10 = sshll.u32 %s218_s9, 4  ;;  %s1942_s13 = sshll.u32 %s2508_s19, 8 }
  0x3a   : > { %s1940_s28 = sshll.u32 %s222_s23, 7  ;;  %s1941_s27 = sshll.u32 %s222_s23, 3  ;;  %2054 = vmatprep.subr.bf16.mxu1 %v2311_v19 }
  0x3b   : > { %s2575_s29 = scalar_lea.vmem %s2972_s0, %s1940_s28  ;;  %s230_s8 = scalar_lea.vmem %s2973_s1, %s1941_s27 }
  0x3c   : > { %v238_v1 = vld [vmem:[%s2575_s29 + $0x10] sm:$0xff]  ;;  %v236_v2 = vld [vmem:[%s2575_s29] sm:$0xff]  ;;  %v239_v3 = vld [vmem:[%s2575_s29 + $0x18] sm:$0xff]  ;;  %s220_s14 = scalar_lea.vmem [#allocation5], %s1856_s10  ;;  %s2925_s28 = scalar_lea.hbm %s2976_s4, %s1942_s13 }
  0x3d   : > { %259 = vperm.xlu1 %2308, %v238_v1   ;;  %253 = vperm.xlu0 %2307, %v236_v2   ;;  %v237_v4 = vld [vmem:[%s2575_s29 + $0x8] sm:$0xff]  ;;  %v240_v6 = vld [vmem:[%s2575_s29 + $0x20] sm:$0xff]  ;;  %v243_v8 = vld [vmem:[%s2575_s29 + $0x38] sm:$0xff]  ;;  %s1764_s20 = sshll.u32 %s220_s14, 4  ;;  %s2931_s30 = scalar_lea.sflag [#allocation4], %s218_s9  ;;  %s2927_s20 = int_to_ptr.vmem [resolvable:$true] %s1764_s20 }
  0x3e   : > { %v241_v5 = vld [vmem:[%s2575_s29 + $0x28] sm:$0xff]  ;;  %v2586_v7 = vld [vmem:[%s230_s8] sm:$0xff]   ;;  %v242_v9 = vld [vmem:[%s2575_s29 + $0x30] sm:$0xff]  ;;  %2055 = vmatpush3.bf16.msra.mxu1 %v2311_v19  ;;  %s2385_s19 = scalar_lea.vmem %s2927_s20, 256  ;;  %p2997_p9 = scmp.ne.s32.totalorder %s2980_s25, 0 }
  0x3f   : > { %2034 = vmatprep.subr.bf16.mxu0 %v2586_v7  ;;  %v245_v10 = vld [vmem:[%s2575_s29 + $0x48] sm:$0xff]  ;;  %v244_v11 = vld [vmem:[%s2575_s29 + $0x40] sm:$0xff]  ;;  %v247_v12 = vld [vmem:[%s2575_s29 + $0x58] sm:$0xff]  ;;  %2056 = vmatprep.subr.bf16.mxu1 %v2312_v20  ;;  %p2386_p6 = scmp.ne.s32.totalorder %s2927_s20, %s2385_s19  ;;  %s2459_s5 = smov [#allocation5]  }
  0x40   : > { %2035 = vmatpush3.bf16.msra.mxu0 %v2586_v7  ;;  %v246_v13 = vld [vmem:[%s2575_s29 + $0x50] sm:$0xff]  ;;  %v249_v14 = vld [vmem:[%s2575_s29 + $0x68] sm:$0xff]  ;;  %v248_v15 = vld [vmem:[%s2575_s29 + $0x60] sm:$0xff] }
  0x41   : > { %262 = vperm.xlu1 %2308, %v239_v3   ;;  %256 = vperm.xlu0 %2307, %v237_v4   ;;  %v251_v16 = vld [vmem:[%s2575_s29 + $0x78] sm:$0xff]  ;;  %v250_v17 = vld [vmem:[%s2575_s29 + $0x70] sm:$0xff]  ;;  %v2316_v3 = vld [vmem:[#allocation2 + $0x30] sm:$0xff]   ;;  %p2387_p10 = pnand %p2386_p6, %p2997_p9  ;;  %s2389_s29 = sshll.u32 %s2459_s5, 4  ;;  %s2390_s29 = int_to_ptr.vmem [resolvable:$false] %s2389_s29 }
  0x42   : > { %2057 = vmatpush3.bf16.msra.mxu1 %v2312_v20  ;;  %v2317_v4 = vld [vmem:[#allocation2 + $0x38] sm:$0xff]   ;;  %s2391_s27 = scalar_lea.vmem %s2390_s29, 512  ;;  %p2392_p2 = scmp.lt.s32.totalorder %s2927_s20, %s2390_s29 }
  0x43   : > { %2058 = vmatprep.subr.bf16.mxu1 %v2313_v21  ;;  %p2388_p12 = pneg %p2387_p10  ;;  %p2393_p3 = scmp.lt.s32.totalorder %s2391_s27, %s2385_s19 }
  0x45   : > { %268 = vperm.xlu1 %2308, %v241_v5   ;;  %265 = vperm.xlu0 %2307, %v240_v6   ;;  %v485_v5 = vunpack.c.l.bf16 %v2586_v7  ;;  %v486_v6 = vunpack.c.h.bf16 %v2586_v7  ;;  %p2394_p4 = por %p2393_p3, %p2392_p2 }
  0x46   : > { %2059 = vmatpush3.bf16.msra.mxu1 %v2313_v21 }
  0x47   : > { %2060 = vmatprep.subr.bf16.mxu1 %v2314_v22  ;;  %p2395_p7 = pnand %p2394_p4, %p2388_p12 }
  0x49   : > { %274 = vperm.xlu1 %2308, %v243_v8   ;;  %271 = vperm.xlu0 %2307, %v242_v9  }
  0x4a   : > { %2061 = vmatpush3.bf16.msra.mxu1 %v2314_v22 }
  0x4b   : > { %2062 = vmatprep.subr.bf16.mxu1 %v2315_v23 }
  0x4d   : > { %280 = vperm.xlu1 %2308, %v245_v10   ;;  %277 = vperm.xlu0 %2307, %v244_v11  }
  0x4e   : > { %2063 = vmatpush3.bf16.msra.mxu1 %v2315_v23 }
  0x4f   : > { %2064 = vmatprep.subr.bf16.mxu1 %v2316_v3 }
  0x51   : > { %286 = vperm.xlu1 %2308, %v247_v12   ;;  %283 = vperm.xlu0 %2307, %v246_v13  }
  0x52   : > { %2065 = vmatpush3.bf16.msra.mxu1 %v2316_v3 }
  0x53   : > { %2066 = vmatprep.subr.bf16.mxu1 %v2317_v4 }
  0x55   : > { %292 = vperm.xlu1 %2308, %v249_v14   ;;  %289 = vperm.xlu0 %2307, %v248_v15  }
  0x56   : > { %2067 = vmatpush3.bf16.msra.mxu1 %v2317_v4 }
  0x59   : > { %298 = vperm.xlu1 %2308, %v251_v16   ;;  %295 = vperm.xlu0 %2307, %v250_v17  }
  0xbc   : > { %v260_v26 = vpop.permute.xlu1 %259  ;;  %v254_v27 = vpop.permute.xlu0 %253 }
  0xbd   : > { %vm302_vm0 = vcmp.eq.s32.totalorder %v2600_v25, %v260_v26  ;;  %vm300_vm1 = vcmp.eq.s32.totalorder %v2600_v25, %v254_v27 }
  0xbe   : > { %v1863_v31 = vsel %vm302_vm0, 1.0, %v2457_v30  ;;  %v1861_v32 = vsel %vm300_vm1, 1.0, %v2457_v30  ;;  %vm484_vm1 = vcmp.lt.s32.totalorder %v2600_v25, 3 }
  0xbf   : > { %v487_v8 = vsel %vm484_vm1, %v485_v5, 0.0  ;;  %v488_v9 = vsel %vm484_vm1, %v486_v6, 0.0 }
  0xc0   : > { %v263_v28 = vpop.permute.xlu1 %262  ;;  %v257_v29 = vpop.permute.xlu0 %256 }
  0xc1   : > { %vm303_vm2 = vcmp.eq.s32.totalorder %v2600_v25, %v263_v28  ;;  %vm301_vm3 = vcmp.eq.s32.totalorder %v2600_v25, %v257_v29 }
  0xc2   : > { %v1864_v33 = vsel %vm303_vm2, 1.0, %v2457_v30  ;;  %v1862_v34 = vsel %vm301_vm3, 1.0, %v2457_v30  ;;  %vm2458_vm2 = vmmov 0  }
  0xc3   : > { %v2610_v35 = vpack.c.bf16 %v1864_v33, %v1863_v31  ;;  %v2612_v36 = vpack.c.bf16 %v1862_v34, %v1861_v32 }
  0xc4   : > { %v269_v37 = vpop.permute.xlu1 %268  ;;  %v266_v38 = vpop.permute.xlu0 %265 }
  0xc5   : > { %vm305_vm5 = vcmp.eq.s32.totalorder %v2600_v25, %v269_v37  ;;  %vm304_vm6 = vcmp.eq.s32.totalorder %v2600_v25, %v266_v38  ;;  %2036 = vmatprep.mubr.msk.bf16.mxu0 %vm362_vm4, %v2612_v36 }
  0xc6   : > { %v1866_v39 = vsel %vm305_vm5, 1.0, %v2457_v30  ;;  %v1865_v40 = vsel %vm304_vm6, 1.0, %v2457_v30  ;;  %2037 = vmatmul.mubr.msk.bf16.vlgmr.msra.gmra.mrb[0].mxu0 %vm362_vm4, %v2610_v35 }
  0xc7   : > { %v2622_v41 = vpack.c.bf16 %v1866_v39, %v1865_v40 }
  0xc8   : > { %v275_v42 = vpop.permute.xlu1 %274  ;;  %v272_v43 = vpop.permute.xlu0 %271 }
  0xc9   : > { %vm307_vm7 = vcmp.eq.s32.totalorder %v2600_v25, %v275_v42  ;;  %vm306_vm8 = vcmp.eq.s32.totalorder %v2600_v25, %v272_v43  ;;  %2040 = vmatprep.mubr.msk.bf16.mxu0 %vm362_vm4, %v2622_v41 }
  0xca   : > { %v1868_v44 = vsel %vm307_vm7, 1.0, %v2457_v30  ;;  %v1867_v45 = vsel %vm306_vm8, 1.0, %v2457_v30 }
  0xcb   : > { %v2630_v46 = vpack.c.bf16 %v1868_v44, %v1867_v45 }
  0xcc   : > { %v281_v47 = vpop.permute.xlu1 %280  ;;  %v278_v48 = vpop.permute.xlu0 %277 }
  0xcd   : > { %vm309_vm9 = vcmp.eq.s32.totalorder %v2600_v25, %v281_v47  ;;  %vm308_vm10 = vcmp.eq.s32.totalorder %v2600_v25, %v278_v48 }
  0xce   : > { %v1870_v49 = vsel %vm309_vm9, 1.0, %v2457_v30  ;;  %v1869_v50 = vsel %vm308_vm10, 1.0, %v2457_v30  ;;  %2041 = vmatmul.mubr.msk.bf16.gmra.mrb[4].mxu0 %vm362_vm4, %v2630_v46 }
  0xcf   : > { %v2638_v51 = vpack.c.bf16 %v1870_v49, %v1869_v50 }
  0xd0   : > { %v287_v52 = vpop.permute.xlu1 %286  ;;  %v284_v53 = vpop.permute.xlu0 %283 }
  0xd1   : > { %vm311_vm11 = vcmp.eq.s32.totalorder %v2600_v25, %v287_v52  ;;  %vm310_vm12 = vcmp.eq.s32.totalorder %v2600_v25, %v284_v53  ;;  %2044 = vmatprep.mubr.msk.bf16.mxu0 %vm362_vm4, %v2638_v51 }
  0xd2   : > { %v1872_v54 = vsel %vm311_vm11, 1.0, %v2457_v30  ;;  %v1871_v55 = vsel %vm310_vm12, 1.0, %v2457_v30 }
  0xd3   : > { %v2646_v56 = vpack.c.bf16 %v1872_v54, %v1871_v55  ;;  %v2318_v55 = vld [vmem:[#allocation2 + $0x40] sm:$0xff]  }
  0xd4   : > { %v293_v57 = vpop.permute.xlu1 %292  ;;  %v290_v58 = vpop.permute.xlu0 %289  ;;  %2084 = vmatprep.subr.bf16.mxu0 %v2318_v55 }
  0xd5   : > { %vm313_vm13 = vcmp.eq.s32.totalorder %v2600_v25, %v293_v57  ;;  %vm312_vm14 = vcmp.eq.s32.totalorder %v2600_v25, %v290_v58  ;;  %2085 = vmatpush3.bf16.msra.mxu0 %v2318_v55  ;;  %v2319_v57 = vld [vmem:[#allocation2 + $0x48] sm:$0xff]   ;;  %v2320_v58 = vld [vmem:[#allocation2 + $0x50] sm:$0xff]  }
  0xd6   : > { %v1874_v59 = vsel %vm313_vm13, 1.0, %v2457_v30  ;;  %v1873_v60 = vsel %vm312_vm14, 1.0, %v2457_v30  ;;  %2045 = vmatmul.mubr.msk.bf16.gmra.mrb[8].mxu0 %vm362_vm4, %v2646_v56  ;;  %2086 = vmatprep.subr.bf16.mxu0 %v2319_v57 }
  0xd7   : > { %v2654_v61 = vpack.c.bf16 %v1874_v59, %v1873_v60  ;;  %v2321_v59 = vld [vmem:[#allocation2 + $0x58] sm:$0xff]   ;;  %v2322_v60 = vld [vmem:[#allocation2 + $0x60] sm:$0xff]  }
  0xd8   : > { %v299_v62 = vpop.permute.xlu1 %298  ;;  %v296_v63 = vpop.permute.xlu0 %295 }
  0xd9   : > { %vm315_vm15 = vcmp.eq.s32.totalorder %v2600_v25, %v299_v62  ;;  %vm314_vm0 = vcmp.eq.s32.totalorder %v2600_v25, %v296_v63  ;;  %2048 = vmatprep.mubr.msk.bf16.mxu0 %vm362_vm4, %v2654_v61  ;;  %2087 = vmatpush3.bf16.msra.mxu0 %v2319_v57  ;;  %v2323_v62 = vld [vmem:[#allocation2 + $0x68] sm:$0xff]   ;;  %v2324_v63 = vld [vmem:[#allocation2 + $0x70] sm:$0xff]  }
  0xda   : > { %v1876_v0 = vsel %vm315_vm15, 1.0, %v2457_v30  ;;  %v1875_v1 = vsel %vm314_vm0, 1.0, %v2457_v30  ;;  %2088 = vmatprep.subr.bf16.mxu0 %v2320_v58 }
  0xdb   : > { %v2662_v2 = vpack.c.bf16 %v1876_v0, %v1875_v1  ;;  %v2325_v0 = vld [vmem:[#allocation2 + $0x78] sm:$0xff]  }
  0xdd   : > { %2089 = vmatpush3.bf16.msra.mxu0 %v2320_v58 }
  0xde   : > { %2049 = vmatmul.mubr.msk.bf16.gmra.mrb[12].mxu0 %vm362_vm4, %v2662_v2  ;;  %2090 = vmatprep.subr.bf16.mxu0 %v2321_v59 }
  0xe1   : > { %2091 = vmatpush3.bf16.msra.mxu0 %v2321_v59 }
  0xe2   : > { %2092 = vmatprep.subr.bf16.mxu0 %v2322_v60 }
  0xe5   : > { %2093 = vmatpush3.bf16.msra.mxu0 %v2322_v60 }
  0xe6   : > { %2094 = vmatprep.subr.bf16.mxu0 %v2323_v62 }
  0xe9   : > { %2095 = vmatpush3.bf16.msra.mxu0 %v2323_v62 }
  0xea   : > { %2096 = vmatprep.subr.bf16.mxu0 %v2324_v63 }
  0xed   : > { %2097 = vmatpush3.bf16.msra.mxu0 %v2324_v63 }
  0xee   : > { %2098 = vmatprep.subr.bf16.mxu0 %v2325_v0 }
  0xf1   : > { %2099 = vmatpush3.bf16.msra.mxu0 %v2325_v0 }
  0xf2   : > { %2148 = vmatprep.subr.bf16.mxu0 %v2457_v30 }
 0x199   : > { %v2038_v10 = vpop.f32.mrb[0].mxu0 }
 0x19a   : > { %v491_v11 = vsub.f32 %v2038_v10, %v487_v8  ;;  %v421_v12 = vpop.f32.mrb[1].mxu0 }
 0x19b   : > { %v489_v13 = vsub.f32 %v421_v12, %v487_v8  ;;  %v2039_v14 = vpop.f32.mrb[2].mxu0 }
 0x19c   : > { %v492_v15 = vsub.f32 %v2039_v14, %v488_v9  ;;  %v424_v16 = vpop.f32.mrb[3].mxu0 }
 0x19d   : > { %v490_v17 = vsub.f32 %v424_v16, %v488_v9 }
 0x19e   : > { %v2669_v18 = vpack.c.bf16 %v492_v15, %v491_v11 }
 0x19f   : > { %v2671_v19 = vpack.c.bf16 %v490_v17, %v489_v13 }
 0x1a1   : > { %v2042_v20 = vpop.f32.mrb[4].mxu0  ;;  %2068 = vmatprep.mubr.bf16.mxu1 %v2671_v19 }
 0x1a2   : > { %v495_v21 = vsub.f32 %v2042_v20, %v487_v8  ;;  %v437_v22 = vpop.f32.mrb[5].mxu0  ;;  %2069 = vmatmul.mubr.bf16.vlgmr.msra.gmra.mrb[0].mxu1 %v2669_v18 }
 0x1a3   : > { %v493_v7 = vsub.f32 %v437_v22, %v487_v8  ;;  %v2043_v23 = vpop.f32.mrb[6].mxu0 }
 0x1a4   : > { %v496_v24 = vsub.f32 %v2043_v23, %v488_v9  ;;  %v440_v25 = vpop.f32.mrb[7].mxu0 }
 0x1a5   : > { %v494_v26 = vsub.f32 %v440_v25, %v488_v9 }
 0x1a6   : > { %v2675_v27 = vpack.c.bf16 %v496_v24, %v495_v21 }
 0x1a7   : > { %v2677_v28 = vpack.c.bf16 %v494_v26, %v493_v7 }
 0x1a9   : > { %v2046_v29 = vpop.f32.mrb[8].mxu0  ;;  %2072 = vmatprep.mubr.bf16.mxu1 %v2677_v28 }
 0x1aa   : > { %v499_v31 = vsub.f32 %v2046_v29, %v487_v8  ;;  %v453_v32 = vpop.f32.mrb[9].mxu0  ;;  %2073 = vmatmul.mubr.bf16.gmra.mrb[4].mxu1 %v2675_v27 }
 0x1ab   : > { %v497_v33 = vsub.f32 %v453_v32, %v487_v8  ;;  %v2047_v34 = vpop.f32.mrb[10].mxu0 }
 0x1ac   : > { %v500_v37 = vsub.f32 %v2047_v34, %v488_v9  ;;  %v456_v38 = vpop.f32.mrb[11].mxu0 }
 0x1ad   : > { %v498_v39 = vsub.f32 %v456_v38, %v488_v9 }
 0x1ae   : > { %v2681_v40 = vpack.c.bf16 %v500_v37, %v499_v31 }
 0x1af   : > { %v2683_v42 = vpack.c.bf16 %v498_v39, %v497_v33 }
 0x1b1   : > { %v2050_v43 = vpop.f32.mrb[12].mxu0  ;;  %2076 = vmatprep.mubr.bf16.mxu1 %v2683_v42 }
 0x1b2   : > { %v503_v44 = vsub.f32 %v2050_v43, %v487_v8  ;;  %v469_v45 = vpop.f32.mrb[13].mxu0  ;;  %2077 = vmatmul.mubr.bf16.gmra.mrb[8].mxu1 %v2681_v40 }
 0x1b3   : > { %v501_v47 = vsub.f32 %v469_v45, %v487_v8  ;;  %v2051_v48 = vpop.f32.mrb[14].mxu0 }
 0x1b4   : > { %v504_v49 = vsub.f32 %v2051_v48, %v488_v9  ;;  %v472_v50 = vpop.f32.mrb[15].mxu0 }
 0x1b5   : > { %v502_v52 = vsub.f32 %v472_v50, %v488_v9 }
 0x1b6   : > { %v2687_v53 = vpack.c.bf16 %v504_v49, %v503_v44 }
 0x1b7   : > { %v2689_v54 = vpack.c.bf16 %v502_v52, %v501_v47 }
 0x1b9   : > { %2080 = vmatprep.mubr.bf16.mxu1 %v2689_v54 }
 0x1ba   : > { %2081 = vmatmul.mubr.bf16.gmra.mrb[12].mxu1 %v2687_v53 }
 0x275   : > { %v2070_v1 = vpop.f32.mrb[0].mxu1 }
 0x276   : > { %v611_v3 = vpop.f32.mrb[1].mxu1 }
 0x277   : > { %v2071_v4 = vpop.f32.mrb[2].mxu1 }
 0x278   : > { %v614_v5 = vpop.f32.mrb[3].mxu1 }
 0x279   : > { %v674_v6 = vadd.f32 %v614_v5, %v611_v3 }
 0x27b   : > { %v675_v8 = vadd.f32 %v2070_v1, %v674_v6 }
 0x27d   : > { %v2074_v9 = vpop.f32.mrb[4].mxu1  ;;  %v676_v10 = vadd.f32 %v2071_v4, %v675_v8 }
 0x27e   : > { %v627_v11 = vpop.f32.mrb[5].mxu1 }
 0x27f   : > { %v677_v12 = vadd.f32 %v676_v10, %v627_v11  ;;  %v2075_v13 = vpop.f32.mrb[6].mxu1 }
 0x280   : > { %v630_v14 = vpop.f32.mrb[7].mxu1 }
 0x281   : > { %v678_v15 = vadd.f32 %v677_v12, %v630_v14 }
 0x283   : > { %v679_v16 = vadd.f32 %v2074_v9, %v678_v15 }
 0x285   : > { %v2078_v17 = vpop.f32.mrb[8].mxu1  ;;  %v680_v20 = vadd.f32 %v2075_v13, %v679_v16 }
 0x286   : > { %v643_v21 = vpop.f32.mrb[9].mxu1 }
 0x287   : > { %v681_v22 = vadd.f32 %v680_v20, %v643_v21  ;;  %v2079_v7 = vpop.f32.mrb[10].mxu1 }
 0x288   : > { %v646_v23 = vpop.f32.mrb[11].mxu1 }
 0x289   : > { %v682_v24 = vadd.f32 %v681_v22, %v646_v23 }
 0x28b   : > { %v683_v25 = vadd.f32 %v2078_v17, %v682_v24 }
 0x28d   : > { %v2082_v26 = vpop.f32.mrb[12].mxu1  ;;  %v684_v29 = vadd.f32 %v2079_v7, %v683_v25 }
 0x28e   : > { %v659_v31 = vpop.f32.mrb[13].mxu1 }
 0x28f   : > { %v685_v32 = vadd.f32 %v684_v29, %v659_v31  ;;  %v2083_v33 = vpop.f32.mrb[14].mxu1 }
 0x290   : > { %v662_v34 = vpop.f32.mrb[15].mxu1 }
 0x291   : > { %v686_v37 = vadd.f32 %v685_v32, %v662_v34 }
 0x293   : > { %v687_v38 = vadd.f32 %v2082_v26, %v686_v37 }
 0x295   : > { %v688_v39 = vadd.f32 %v2083_v33, %v687_v38 }
 0x297   : > { %v689_v43 = vrot.slane %v688_v39, 4 }
 0x299   : > { %v690_v44 = vadd.f32 %v689_v43, %v688_v39 }
 0x29b   : > { %v691_v45 = vrot.slane %v690_v44, 2 }
 0x29d   : > { %v692_v47 = vadd.f32 %v691_v45, %v690_v44 }
 0x29f   : > { %v693_v48 = vrot.slane %v692_v47, 1 }
 0x2a1   : > { %v694_v49 = vadd.f32 %v693_v48, %v692_v47 }
 0x2a3   : > { %v695_v50 = vmul.f32 0.0078125, %v694_v49 }
 0x2a5   : > { %v696_v52 = vsub.f32 %v611_v3, %v695_v50  ;;  %v697_v55 = vsub.f32 %v614_v5, %v695_v50  ;;  %v698_v57 = vsub.f32 %v2070_v1, %v695_v50  ;;  %v699_v58 = vsub.f32 %v2071_v4, %v695_v50 }
 0x2a6   : > { %v700_v59 = vsub.f32 %v627_v11, %v695_v50  ;;  %v701_v60 = vsub.f32 %v630_v14, %v695_v50  ;;  %v702_v62 = vsub.f32 %v2074_v9, %v695_v50  ;;  %v2694_v63 = vsub.f32 %v2075_v13, %v695_v50 }
 0x2a7   : > { %v2696_v0 = vsub.f32 %v643_v21, %v695_v50  ;;  %v2698_v6 = vsub.f32 %v646_v23, %v695_v50  ;;  %v2700_v8 = vsub.f32 %v2078_v17, %v695_v50  ;;  %v2702_v10 = vsub.f32 %v2079_v7, %v695_v50 }
 0x2a8   : > { %v2704_v12 = vsub.f32 %v659_v31, %v695_v50  ;;  %v709_v15 = vsub.f32 %v662_v34, %v695_v50  ;;  %v2706_v3 = vsub.f32 %v2082_v26, %v695_v50  ;;  %v2708_v1 = vsub.f32 %v2083_v33, %v695_v50 }
 0x2a9   : > { %v712_v4 = vmul.f32 %v696_v52, %v696_v52  ;;  %v713_v5 = vmul.f32 %v697_v55, %v697_v55  ;;  %v714_v9 = vmul.f32 %v698_v57, %v698_v57  ;;  %v715_v13 = vmul.f32 %v699_v58, %v699_v58 }
 0x2aa   : > { %v716_v16 = vmul.f32 %v700_v59, %v700_v59  ;;  %v717_v21 = vmul.f32 %v701_v60, %v701_v60  ;;  %v718_v22 = vmul.f32 %v702_v62, %v702_v62  ;;  %v719_v23 = vmul.f32 %v2694_v63, %v2694_v63 }
 0x2ab   : > { %v728_v11 = vadd.f32 %v713_v5, %v712_v4  ;;  %v720_v25 = vmul.f32 %v2696_v0, %v2696_v0  ;;  %v721_v29 = vmul.f32 %v2698_v6, %v2698_v6  ;;  %v722_v32 = vmul.f32 %v2700_v8, %v2700_v8 }
 0x2ac   : > { %v723_v34 = vmul.f32 %v2702_v10, %v2702_v10  ;;  %v724_v38 = vmul.f32 %v2704_v12, %v2704_v12  ;;  %v725_v43 = vmul.f32 %v709_v15, %v709_v15  ;;  %v726_v45 = vmul.f32 %v2706_v3, %v2706_v3 }
 0x2ad   : > { %v729_v14 = vadd.f32 %v728_v11, %v714_v9  ;;  %v727_v48 = vmul.f32 %v2708_v1, %v2708_v1 }
 0x2af   : > { %v730_v20 = vadd.f32 %v729_v14, %v715_v13 }
 0x2b1   : > { %v731_v17 = vadd.f32 %v730_v20, %v716_v16 }
 0x2b3   : > { %v732_v7 = vadd.f32 %v731_v17, %v717_v21 }
 0x2b5   : > { %v733_v24 = vadd.f32 %v732_v7, %v718_v22 }
 0x2b7   : > { %v734_v26 = vadd.f32 %v733_v24, %v719_v23 }
 0x2b9   : > { %v735_v31 = vadd.f32 %v734_v26, %v720_v25 }
 0x2bb   : > { %v736_v33 = vadd.f32 %v735_v31, %v721_v29 }
 0x2bd   : > { %v737_v37 = vadd.f32 %v736_v33, %v722_v32 }
 0x2bf   : > { %v738_v39 = vadd.f32 %v737_v37, %v723_v34 }
 0x2c1   : > { %v739_v44 = vadd.f32 %v738_v39, %v724_v38 }
 0x2c3   : > { %v740_v47 = vadd.f32 %v739_v44, %v725_v43 }
 0x2c5   : > { %v741_v49 = vadd.f32 %v740_v47, %v726_v45 }
 0x2c7   : > { %v742_v50 = vadd.f32 %v741_v49, %v727_v48 }
 0x2c9   : > { %v743_v4 = vrot.slane %v742_v50, 4 }
 0x2cb   : > { %v744_v5 = vadd.f32 %v743_v4, %v742_v50 }
 0x2cd   : > { %v745_v9 = vrot.slane %v744_v5, 2 }
 0x2cf   : > { %v746_v11 = vadd.f32 %v745_v9, %v744_v5 }
 0x2d1   : > { %v747_v13 = vrot.slane %v746_v11, 1 }
 0x2d3   : > { %v748_v14 = vadd.f32 %v747_v13, %v746_v11 }
 0x2d5   : > { %v749_v16 = vmul.f32 0.0078125, %v748_v14 }
 0x2d7   : > { %v750_v20 = vadd.f32 1e-05, %v749_v16  ;;  %v2330_v16 = vld [vmem:[#allocation2 + $0xa0] sm:$0xff]  }
 0x2d9   : > { %2351 = vrsqrt.f32 %v750_v20  ;;  %v2331_v20 = vld [vmem:[#allocation2 + $0xa8] sm:$0xff]  }
 0x2e3   : > { %v2352_v21 = vpop.eup %2351 }
 0x2e4   : > { %v765_v17 = vmul.f32 %v2352_v21, %v709_v15  ;;  %v752_v22 = vmul.f32 %v2352_v21, %v696_v52  ;;  %v753_v7 = vmul.f32 %v2352_v21, %v697_v55  ;;  %v754_v23 = vmul.f32 %v2352_v21, %v698_v57 }
 0x2e5   : > { %v755_v24 = vmul.f32 %v2352_v21, %v699_v58  ;;  %v756_v25 = vmul.f32 %v2352_v21, %v700_v59  ;;  %v757_v26 = vmul.f32 %v2352_v21, %v701_v60  ;;  %v758_v29 = vmul.f32 %v2352_v21, %v702_v62 }
 0x2e6   : > { %v781_v31 = vmax.f32 %v765_v17, 0.0  ;;  %v768_v32 = vmax.f32 %v752_v22, 0.0  ;;  %v769_v33 = vmax.f32 %v753_v7, 0.0  ;;  %v770_v34 = vmax.f32 %v754_v23, 0.0  ;;  %v2333_v17 = vld [vmem:[#allocation2 + $0xb8] sm:$0xff]   ;;  %v2734_v22 = vld [vmem:[#allocation2 + $0xc0] sm:$0xff]  }
 0x2e7   : > { %v771_v37 = vmax.f32 %v755_v24, 0.0  ;;  %v772_v38 = vmax.f32 %v756_v25, 0.0  ;;  %v773_v39 = vmax.f32 %v757_v26, 0.0  ;;  %v759_v43 = vmul.f32 %v2352_v21, %v2694_v63 }
 0x2e8   : > { %v784_v44 = vpack.c.bf16 %v769_v33, %v768_v32  ;;  %v774_v45 = vmax.f32 %v758_v29, 0.0  ;;  %v760_v15 = vmul.f32 %v2352_v21, %v2696_v0  ;;  %v761_v52 = vmul.f32 %v2352_v21, %v2698_v6 }
 0x2e9   : > { %v785_v55 = vpack.c.bf16 %v771_v37, %v770_v34  ;;  %v786_v57 = vpack.c.bf16 %v773_v39, %v772_v38  ;;  %v775_v58 = vmax.f32 %v759_v43, 0.0  ;;  %v762_v59 = vmul.f32 %v2352_v21, %v2700_v8 }
 0x2ea   : > { %2100 = vmatprep.mubr.bf16.mxu0 %v784_v44  ;;  %v776_v60 = vmax.f32 %v760_v15, 0.0  ;;  %v777_v62 = vmax.f32 %v761_v52, 0.0  ;;  %v763_v47 = vmul.f32 %v2352_v21, %v2702_v10  ;;  %v764_v48 = vmul.f32 %v2352_v21, %v2704_v12  ;;  %v2326_v10 = vld [vmem:[#allocation2 + $0x80] sm:$0xff]   ;;  %v2327_v12 = vld [vmem:[#allocation2 + $0x88] sm:$0xff]  }
 0x2eb   : > { %2101 = vmatmul.mubr.bf16.vlgmr.msra.gmra.mrb[16].mxu0 %v785_v55  ;;  %v787_v63 = vpack.c.bf16 %v775_v58, %v774_v45  ;;  %v778_v49 = vmax.f32 %v762_v59, 0.0  ;;  %v766_v50 = vmul.f32 %v2352_v21, %v2706_v3  ;;  %v767_v0 = vmul.f32 %v2352_v21, %v2708_v1  ;;  %2116 = vmatprep.subr.bf16.mxu1 %v2326_v10  ;;  %v2328_v3 = vld [vmem:[#allocation2 + $0x90] sm:$0xff]   ;;  %v2329_v1 = vld [vmem:[#allocation2 + $0x98] sm:$0xff]  }
 0x2ec   : > { %2104 = vmatprep.mubr.bf16.mxu0 %v786_v57  ;;  %v788_v6 = vpack.c.bf16 %v777_v62, %v776_v60  ;;  %v779_v4 = vmax.f32 %v763_v47, 0.0  ;;  %v780_v5 = vmax.f32 %v764_v48, 0.0  ;;  %2117 = vmatpush3.bf16.msra.mxu1 %v2326_v10  ;;  %v2332_v21 = vld [vmem:[#allocation2 + $0xb0] sm:$0xff]  }
 0x2ed   : > { %v782_v9 = vmax.f32 %v766_v50, 0.0  ;;  %v783_v8 = vmax.f32 %v767_v0, 0.0  ;;  %2118 = vmatprep.subr.bf16.mxu1 %v2327_v12 }
 0x2ee   : > { %v789_v11 = vpack.c.bf16 %v779_v4, %v778_v49  ;;  %v790_v13 = vpack.c.bf16 %v781_v31, %v780_v5 }
 0x2ef   : > { %v791_v14 = vpack.c.bf16 %v783_v8, %v782_v9 }
 0x2f0   : > { %2119 = vmatpush3.bf16.msra.mxu1 %v2327_v12 }
 0x2f1   : > { %2120 = vmatprep.subr.bf16.mxu1 %v2328_v3 }
 0x2f3   : > { %2105 = vmatmul.mubr.bf16.gmra.mrb[20].mxu0 %v787_v63 }
 0x2f4   : > { %2108 = vmatprep.mubr.bf16.mxu0 %v788_v6  ;;  %2121 = vmatpush3.bf16.msra.mxu1 %v2328_v3 }
 0x2f5   : > { %2122 = vmatprep.subr.bf16.mxu1 %v2329_v1 }
 0x2f8   : > { %2123 = vmatpush3.bf16.msra.mxu1 %v2329_v1 }
 0x2f9   : > { %2124 = vmatprep.subr.bf16.mxu1 %v2330_v16 }
 0x2fb   : > { %2109 = vmatmul.mubr.bf16.gmra.mrb[24].mxu0 %v789_v11 }
 0x2fc   : > { %2112 = vmatprep.mubr.bf16.mxu0 %v790_v13  ;;  %2125 = vmatpush3.bf16.msra.mxu1 %v2330_v16 }
 0x2fd   : > { %2126 = vmatprep.subr.bf16.mxu1 %v2331_v20 }
 0x300   : > { %2127 = vmatpush3.bf16.msra.mxu1 %v2331_v20 }
 0x301   : > { %2128 = vmatprep.subr.bf16.mxu1 %v2332_v21 }
 0x303   : > { %2113 = vmatmul.mubr.bf16.gmra.mrb[28].mxu0 %v791_v14 }
 0x304   : > { %2129 = vmatpush3.bf16.msra.mxu1 %v2332_v21  ;;  %2164 = vmatprep.mubr.msk.bf16.mxu0 %vm2458_vm2, %v2457_v30 }
 0x305   : > { %2130 = vmatprep.subr.bf16.mxu1 %v2333_v17 }
 0x308   : > { %2131 = vmatpush3.bf16.msra.mxu1 %v2333_v17 }
 0x309   : > { %2218 = vmatprep.subr.bf16.mxu1 %v2734_v22 }
 0x3be   : > { %v2102_v7 = vpop.f32.mrb[16].mxu0 }
 0x3bf   : > { %v891_v23 = vpop.f32.mrb[17].mxu0 }
 0x3c0   : > { %v2103_v24 = vpop.f32.mrb[18].mxu0 }
 0x3c1   : > { %v894_v25 = vpop.f32.mrb[19].mxu0 }
 0x3c2   : > { %v954_v26 = vadd.f32 %v894_v25, %v891_v23 }
 0x3c4   : > { %v955_v29 = vadd.f32 %v2102_v7, %v954_v26 }
 0x3c6   : > { %v2106_v31 = vpop.f32.mrb[20].mxu0  ;;  %v956_v32 = vadd.f32 %v2103_v24, %v955_v29 }
 0x3c7   : > { %v907_v33 = vpop.f32.mrb[21].mxu0 }
 0x3c8   : > { %v957_v34 = vadd.f32 %v956_v32, %v907_v33  ;;  %v2107_v37 = vpop.f32.mrb[22].mxu0 }
 0x3c9   : > { %v910_v38 = vpop.f32.mrb[23].mxu0 }
 0x3ca   : > { %v958_v39 = vadd.f32 %v957_v34, %v910_v38 }
 0x3cc   : > { %v959_v43 = vadd.f32 %v2106_v31, %v958_v39 }
 0x3ce   : > { %v2110_v44 = vpop.f32.mrb[24].mxu0  ;;  %v960_v45 = vadd.f32 %v2107_v37, %v959_v43 }
 0x3cf   : > { %v923_v15 = vpop.f32.mrb[25].mxu0 }
 0x3d0   : > { %v961_v52 = vadd.f32 %v960_v45, %v923_v15  ;;  %v2111_v55 = vpop.f32.mrb[26].mxu0 }
 0x3d1   : > { %v926_v57 = vpop.f32.mrb[27].mxu0 }
 0x3d2   : > { %v962_v58 = vadd.f32 %v961_v52, %v926_v57 }
 0x3d4   : > { %v963_v59 = vadd.f32 %v2110_v44, %v962_v58 }
 0x3d6   : > { %v2114_v60 = vpop.f32.mrb[28].mxu0  ;;  %v964_v62 = vadd.f32 %v2111_v55, %v963_v59 }
 0x3d7   : > { %v939_v47 = vpop.f32.mrb[29].mxu0 }
 0x3d8   : > { %v965_v48 = vadd.f32 %v964_v62, %v939_v47  ;;  %v2115_v63 = vpop.f32.mrb[30].mxu0 }
 0x3d9   : > { %v942_v49 = vpop.f32.mrb[31].mxu0 }
 0x3da   : > { %v966_v50 = vadd.f32 %v965_v48, %v942_v49 }
 0x3dc   : > { %v967_v0 = vadd.f32 %v2114_v60, %v966_v50 }
 0x3de   : > { %v968_v6 = vadd.f32 %v2115_v63, %v967_v0 }
 0x3e0   : > { %v969_v4 = vrot.slane %v968_v6, 4 }
 0x3e2   : > { %v970_v5 = vadd.f32 %v969_v4, %v968_v6 }
 0x3e4   : > { %v971_v9 = vrot.slane %v970_v5, 2 }
 0x3e6   : > { %v972_v8 = vadd.f32 %v971_v9, %v970_v5 }
 0x3e8   : > { %v973_v11 = vrot.slane %v972_v8, 1 }
 0x3ea   : > { %v974_v13 = vadd.f32 %v973_v11, %v972_v8 }
 0x3ec   : > { %v975_v14 = vmul.f32 0.0078125, %v974_v13 }
 0x3ee   : > { %v976_v10 = vsub.f32 %v891_v23, %v975_v14  ;;  %v977_v12 = vsub.f32 %v894_v25, %v975_v14  ;;  %v978_v3 = vsub.f32 %v2102_v7, %v975_v14  ;;  %v979_v1 = vsub.f32 %v2103_v24, %v975_v14 }
 0x3ef   : > { %v980_v16 = vsub.f32 %v907_v33, %v975_v14  ;;  %v981_v20 = vsub.f32 %v910_v38, %v975_v14  ;;  %v982_v21 = vsub.f32 %v2106_v31, %v975_v14  ;;  %v2737_v17 = vsub.f32 %v2107_v37, %v975_v14 }
 0x3f0   : > { %v2739_v26 = vsub.f32 %v923_v15, %v975_v14  ;;  %v2741_v29 = vsub.f32 %v926_v57, %v975_v14  ;;  %v2743_v32 = vsub.f32 %v2110_v44, %v975_v14  ;;  %v2745_v34 = vsub.f32 %v2111_v55, %v975_v14 }
 0x3f1   : > { %v2747_v39 = vsub.f32 %v939_v47, %v975_v14  ;;  %v989_v43 = vsub.f32 %v942_v49, %v975_v14  ;;  %v2749_v23 = vsub.f32 %v2114_v60, %v975_v14  ;;  %v2751_v7 = vsub.f32 %v2115_v63, %v975_v14 }
 0x3f2   : > { %v992_v24 = vmul.f32 %v976_v10, %v976_v10  ;;  %v993_v25 = vmul.f32 %v977_v12, %v977_v12  ;;  %v994_v31 = vmul.f32 %v978_v3, %v978_v3  ;;  %v995_v37 = vmul.f32 %v979_v1, %v979_v1 }
 0x3f3   : > { %v996_v45 = vmul.f32 %v980_v16, %v980_v16  ;;  %v997_v52 = vmul.f32 %v981_v20, %v981_v20  ;;  %v998_v57 = vmul.f32 %v982_v21, %v982_v21  ;;  %v999_v58 = vmul.f32 %v2737_v17, %v2737_v17 }
 0x3f4   : > { %v1008_v33 = vadd.f32 %v993_v25, %v992_v24  ;;  %v1000_v60 = vmul.f32 %v2739_v26, %v2739_v26  ;;  %v1001_v47 = vmul.f32 %v2741_v29, %v2741_v29  ;;  %v1002_v63 = vmul.f32 %v2743_v32, %v2743_v32 }
 0x3f5   : > { %v1003_v50 = vmul.f32 %v2745_v34, %v2745_v34  ;;  %v1004_v6 = vmul.f32 %v2747_v39, %v2747_v39  ;;  %v1005_v5 = vmul.f32 %v989_v43, %v989_v43  ;;  %v1006_v8 = vmul.f32 %v2749_v23, %v2749_v23 }
 0x3f6   : > { %v1009_v38 = vadd.f32 %v1008_v33, %v994_v31  ;;  %v1007_v13 = vmul.f32 %v2751_v7, %v2751_v7 }
 0x3f8   : > { %v1010_v15 = vadd.f32 %v1009_v38, %v995_v37 }
 0x3fa   : > { %v1011_v44 = vadd.f32 %v1010_v15, %v996_v45 }
 0x3fc   : > { %v1012_v55 = vadd.f32 %v1011_v44, %v997_v52 }
 0x3fe   : > { %v1013_v59 = vadd.f32 %v1012_v55, %v998_v57 }
 0x400   : > { %v1014_v62 = vadd.f32 %v1013_v59, %v999_v58 }
 0x402   : > { %v1015_v48 = vadd.f32 %v1014_v62, %v1000_v60 }
 0x404   : > { %v1016_v49 = vadd.f32 %v1015_v48, %v1001_v47 }
 0x406   : > { %v1017_v0 = vadd.f32 %v1016_v49, %v1002_v63 }
 0x408   : > { %v1018_v4 = vadd.f32 %v1017_v0, %v1003_v50 }
 0x40a   : > { %v1019_v9 = vadd.f32 %v1018_v4, %v1004_v6 }
 0x40c   : > { %v1020_v11 = vadd.f32 %v1019_v9, %v1005_v5 }
 0x40e   : > { %v1021_v14 = vadd.f32 %v1020_v11, %v1006_v8 }
 0x410   : > { %v1022_v24 = vadd.f32 %v1021_v14, %v1007_v13 }
 0x412   : > { %v1023_v25 = vrot.slane %v1022_v24, 4 }
 0x414   : > { %v1024_v31 = vadd.f32 %v1023_v25, %v1022_v24 }
 0x416   : > { %v1025_v33 = vrot.slane %v1024_v31, 2 }
 0x418   : > { %v1026_v37 = vadd.f32 %v1025_v33, %v1024_v31 }
 0x41a   : > { %v1027_v38 = vrot.slane %v1026_v37, 1 }
 0x41c   : > { %v1028_v45 = vadd.f32 %v1027_v38, %v1026_v37  ;;  %v2781_v37 = vld [vmem:[#allocation2 + $0xd0] sm:$0xff]  }
 0x41e   : > { %v1029_v15 = vmul.f32 0.0078125, %v1028_v45 }
 0x420   : > { %v1030_v52 = vadd.f32 1e-05, %v1029_v15 }
 0x422   : > { %2353 = vrsqrt.f32 %v1030_v52  ;;  %v2793_v52 = vld [vmem:[#allocation2 + $0xe8] sm:$0xff]  }
 0x42c   : > { %v2354_v44 = vpop.eup %2353 }
 0x42d   : > { %v1045_v57 = vmul.f32 %v2354_v44, %v989_v43  ;;  %v1032_v55 = vmul.f32 %v2354_v44, %v976_v10  ;;  %v1033_v58 = vmul.f32 %v2354_v44, %v977_v12  ;;  %v1034_v59 = vmul.f32 %v2354_v44, %v978_v3 }
 0x42e   : > { %v1035_v60 = vmul.f32 %v2354_v44, %v979_v1  ;;  %v1036_v62 = vmul.f32 %v2354_v44, %v980_v16  ;;  %v1037_v47 = vmul.f32 %v2354_v44, %v981_v20  ;;  %v1038_v48 = vmul.f32 %v2354_v44, %v982_v21  ;;  %v2772_v1 = vld [vmem:[#allocation2 + $0xc8] sm:$0xff]  }
 0x42f   : > { %v1061_v63 = vmax.f32 %v1045_v57, 0.0  ;;  %v1048_v49 = vmax.f32 %v1032_v55, 0.0  ;;  %v1049_v50 = vmax.f32 %v1033_v58, 0.0  ;;  %v1050_v0 = vmax.f32 %v1034_v59, 0.0  ;;  %v2801_v57 = vld [vmem:[#allocation2 + $0xf8] sm:$0xff]   ;;  %v2342_v55 = vld [vmem:[#allocation2 + $0x100] sm:$0xff]  }
 0x430   : > { %v1051_v6 = vmax.f32 %v1035_v60, 0.0  ;;  %v1052_v4 = vmax.f32 %v1036_v62, 0.0  ;;  %v1053_v5 = vmax.f32 %v1037_v47, 0.0  ;;  %v1039_v9 = vmul.f32 %v2354_v44, %v2737_v17  ;;  %2149 = vmatpush3.bf16.msra.mxu0 %v2342_v55  ;;  %v2343_v58 = vld [vmem:[#allocation2 + $0x108] sm:$0xff]  }
 0x431   : > { %v1064_v8 = vpack.c.bf16 %v1049_v50, %v1048_v49  ;;  %v1054_v11 = vmax.f32 %v1038_v48, 0.0  ;;  %v1040_v43 = vmul.f32 %v2354_v44, %v2739_v26  ;;  %v1041_v10 = vmul.f32 %v2354_v44, %v2741_v29  ;;  %2150 = vmatprep.subr.bf16.mxu0 %v2457_v30 }
 0x432   : > { %v1065_v12 = vpack.c.bf16 %v1051_v6, %v1050_v0  ;;  %v1066_v3 = vpack.c.bf16 %v1053_v5, %v1052_v4  ;;  %v1055_v16 = vmax.f32 %v1039_v9, 0.0  ;;  %v1042_v20 = vmul.f32 %v2354_v44, %v2743_v32 }
 0x433   : > { %2132 = vmatprep.mubr.bf16.mxu1 %v1064_v8  ;;  %v1056_v21 = vmax.f32 %v1040_v43, 0.0  ;;  %v1057_v13 = vmax.f32 %v1041_v10, 0.0  ;;  %v1043_v14 = vmul.f32 %v2354_v44, %v2745_v34  ;;  %v1044_v17 = vmul.f32 %v2354_v44, %v2747_v39 }
 0x434   : > { %2133 = vmatmul.mubr.bf16.vlgmr.msra.gmra.mrb[16].mxu1 %v1065_v12  ;;  %v1067_v24 = vpack.c.bf16 %v1055_v16, %v1054_v11  ;;  %v1058_v25 = vmax.f32 %v1042_v20, 0.0  ;;  %v1046_v26 = vmul.f32 %v2354_v44, %v2749_v23  ;;  %v1047_v29 = vmul.f32 %v2354_v44, %v2751_v7  ;;  %v2785_v23 = vld [vmem:[#allocation2 + $0xd8] sm:$0xff]   ;;  %v2789_v7 = vld [vmem:[#allocation2 + $0xe0] sm:$0xff]   ;;  %v2797_v44 = vld [vmem:[#allocation2 + $0xf0] sm:$0xff]   ;;  %2151 = vmatpush3.bf16.msra.mxu0 %v2343_v58 }
 0x435   : > { %2136 = vmatprep.mubr.bf16.mxu1 %v1066_v3  ;;  %2226 = vmatpush3.bf16.msra.mxu1 %v2734_v22  ;;  %v1068_v31 = vpack.c.bf16 %v1057_v13, %v1056_v21  ;;  %v1059_v33 = vmax.f32 %v1043_v14, 0.0  ;;  %v1060_v32 = vmax.f32 %v1044_v17, 0.0 }
 0x436   : > { %2219 = vmatprep.subr.bf16.mxu1 %v2772_v1  ;;  %v1062_v34 = vmax.f32 %v1046_v26, 0.0  ;;  %v1063_v38 = vmax.f32 %v1047_v29, 0.0  ;;  %2152 = vmatprep.subr.bf16.mxu0 %v2457_v30 }
 0x437   : > { %v1069_v39 = vpack.c.bf16 %v1059_v33, %v1058_v25  ;;  %v1070_v45 = vpack.c.bf16 %v1061_v63, %v1060_v32 }
 0x438   : > { %v1071_v15 = vpack.c.bf16 %v1063_v38, %v1062_v34 }
 0x439   : > { %2227 = vmatpush3.bf16.msra.mxu1 %v2772_v1 }
 0x43a   : > { %2220 = vmatprep.subr.bf16.mxu1 %v2781_v37 }
 0x43c   : > { %2137 = vmatmul.mubr.bf16.gmra.mrb[20].mxu1 %v1067_v24 }
 0x43d   : > { %2140 = vmatprep.mubr.bf16.mxu1 %v1068_v31  ;;  %2228 = vmatpush3.bf16.msra.mxu1 %v2781_v37 }
 0x43e   : > { %2221 = vmatprep.subr.bf16.mxu1 %v2785_v23 }
 0x441   : > { %2229 = vmatpush3.bf16.msra.mxu1 %v2785_v23 }
 0x442   : > { %2222 = vmatprep.subr.bf16.mxu1 %v2789_v7 }
 0x444   : > { %2141 = vmatmul.mubr.bf16.gmra.mrb[24].mxu1 %v1069_v39 }
 0x445   : > { %2144 = vmatprep.mubr.bf16.mxu1 %v1070_v45  ;;  %2230 = vmatpush3.bf16.msra.mxu1 %v2789_v7 }
 0x446   : > { %2223 = vmatprep.subr.bf16.mxu1 %v2793_v52 }
 0x449   : > { %2231 = vmatpush3.bf16.msra.mxu1 %v2793_v52 }
 0x44a   : > { %2224 = vmatprep.subr.bf16.mxu1 %v2797_v44 }
 0x44c   : > { %2145 = vmatmul.mubr.bf16.gmra.mrb[28].mxu1 %v1071_v15 }
 0x44d   : > { %2232 = vmatpush3.bf16.msra.mxu1 %v2797_v44  ;;  %2206 = vmatprep.mubr.bf16.mxu1 %v2677_v28  ;;  %v2344_v28 = vld [vmem:[#allocation2 + $0x110] sm:$0xff]  }
 0x44e   : > { %2225 = vmatprep.subr.bf16.mxu1 %v2801_v57  ;;  %2153 = vmatpush3.bf16.msra.mxu0 %v2344_v28 }
 0x44f   : > { %2154 = vmatprep.subr.bf16.mxu0 %v2457_v30 }
 0x451   : > { %2233 = vmatpush3.bf16.msra.mxu1 %v2801_v57 }
 0x454   : > { %2207 = vmatmul.mubr.bf16.vlgmr.msra.gmra.mrb[32].mxu1 %v2675_v27  ;;  %v2345_v27 = vld [vmem:[#allocation2 + $0x118] sm:$0xff]  }
 0x455   : > { %2210 = vmatprep.mubr.bf16.mxu1 %v2683_v42  ;;  %2155 = vmatpush3.bf16.msra.mxu0 %v2345_v27  ;;  %v2347_v42 = vld [vmem:[#allocation2 + $0x128] sm:$0xff]  }
 0x456   : > { %2156 = vmatprep.subr.bf16.mxu0 %v2457_v30 }
 0x45c   : > { %2211 = vmatmul.mubr.bf16.gmra.mrb[36].mxu1 %v2681_v40  ;;  %v2346_v40 = vld [vmem:[#allocation2 + $0x120] sm:$0xff]  }
 0x45d   : > { %2214 = vmatprep.mubr.bf16.mxu1 %v2689_v54  ;;  %2157 = vmatpush3.bf16.msra.mxu0 %v2346_v40  ;;  %v2349_v54 = vld [vmem:[#allocation2 + $0x138] sm:$0xff]  }
 0x45e   : > { %2158 = vmatprep.subr.bf16.mxu0 %v2457_v30 }
 0x461   : > { %2159 = vmatpush3.bf16.msra.mxu0 %v2347_v42 }
 0x462   : > { %2160 = vmatprep.subr.bf16.mxu0 %v2457_v30 }
 0x464   : > { %2215 = vmatmul.mubr.bf16.gmra.mrb[40].mxu1 %v2687_v53  ;;  %v2348_v53 = vld [vmem:[#allocation2 + $0x130] sm:$0xff]  }
 0x465   : > { %2161 = vmatpush3.bf16.msra.mxu0 %v2348_v53 }
 0x466   : > { %2162 = vmatprep.subr.bf16.mxu0 %v2457_v30 }
 0x469   : > { %2163 = vmatpush3.bf16.msra.mxu0 %v2349_v54 }
 0x507   : > { %v2134_v59 = vpop.f32.mrb[16].mxu1 }
 0x508   : > { %v1171_v60 = vpop.f32.mrb[17].mxu1 }
 0x509   : > { %v2135_v62 = vpop.f32.mrb[18].mxu1 }
 0x50a   : > { %v1174_v47 = vpop.f32.mrb[19].mxu1 }
 0x50b   : > { %v1234_v48 = vadd.f32 %v1174_v47, %v1171_v60 }
 0x50d   : > { %v1235_v63 = vadd.f32 %v2134_v59, %v1234_v48 }
 0x50f   : > { %v2138_v49 = vpop.f32.mrb[20].mxu1  ;;  %v1236_v50 = vadd.f32 %v2135_v62, %v1235_v63 }
 0x510   : > { %v1187_v0 = vpop.f32.mrb[21].mxu1 }
 0x511   : > { %v1237_v6 = vadd.f32 %v1236_v50, %v1187_v0  ;;  %v2139_v4 = vpop.f32.mrb[22].mxu1 }
 0x512   : > { %v1190_v5 = vpop.f32.mrb[23].mxu1 }
 0x513   : > { %v1238_v9 = vadd.f32 %v1237_v6, %v1190_v5 }
 0x515   : > { %v1239_v8 = vadd.f32 %v2138_v49, %v1238_v9 }
 0x517   : > { %v2142_v11 = vpop.f32.mrb[24].mxu1  ;;  %v1240_v43 = vadd.f32 %v2139_v4, %v1239_v8 }
 0x518   : > { %v1203_v10 = vpop.f32.mrb[25].mxu1 }
 0x519   : > { %v1241_v12 = vadd.f32 %v1240_v43, %v1203_v10  ;;  %v2143_v3 = vpop.f32.mrb[26].mxu1 }
 0x51a   : > { %v1206_v30 = vpop.f32.mrb[27].mxu1 }
 0x51b   : > { %v1242_v16 = vadd.f32 %v1241_v12, %v1206_v30 }
 0x51d   : > { %v1243_v20 = vadd.f32 %v2142_v11, %v1242_v16 }
 0x51f   : > { %v2146_v21 = vpop.f32.mrb[28].mxu1  ;;  %v1244_v13 = vadd.f32 %v2143_v3, %v1243_v20 }
 0x520   : > { %v1219_v14 = vpop.f32.mrb[29].mxu1 }
 0x521   : > { %v1245_v17 = vadd.f32 %v1244_v13, %v1219_v14  ;;  %v2147_v24 = vpop.f32.mrb[30].mxu1 }
 0x522   : > { %v1222_v25 = vpop.f32.mrb[31].mxu1 }
 0x523   : > { %v1246_v26 = vadd.f32 %v1245_v17, %v1222_v25 }
 0x525   : > { %v1247_v29 = vadd.f32 %v2146_v21, %v1246_v26 }
 0x527   : > { %v1248_v31 = vadd.f32 %v2147_v24, %v1247_v29  ;;  %v2820_v33 = vpop.f32.mrb[32].mxu1 }
 0x528   : > { %v2822_v32 = vpop.f32.mrb[33].mxu1 }
 0x529   : > { %v1249_v34 = vrot.slane %v1248_v31, 4  ;;  %v2824_v38 = vpop.f32.mrb[34].mxu1 }
 0x52a   : > { %v2826_v39 = vpop.f32.mrb[35].mxu1 }
 0x52b   : > { %v1250_v45 = vadd.f32 %v1249_v34, %v1248_v31 }
 0x52d   : > { %v1251_v15 = vrot.slane %v1250_v45, 2 }
 0x52f   : > { %v1252_v55 = vadd.f32 %v1251_v15, %v1250_v45  ;;  %v2828_v58 = vpop.f32.mrb[36].mxu1 }
 0x530   : > { %v2830_v28 = vpop.f32.mrb[37].mxu1 }
 0x531   : > { %v1253_v27 = vrot.slane %v1252_v55, 1  ;;  %v2832_v40 = vpop.f32.mrb[38].mxu1 }
 0x532   : > { %v2834_v42 = vpop.f32.mrb[39].mxu1 }
 0x533   : > { %2987 = vst [vmem:[#allocation8_spill] sm:$0xff] %v2834_v42  ;;  %v1254_v53 = vadd.f32 %v1253_v27, %v1252_v55 }
 0x535   : > { %v1255_v54 = vmul.f32 0.0078125, %v1254_v53 }
 0x537   : > { %v2836_v48 = vsub.f32 %v1171_v60, %v1255_v54  ;;  %v2838_v63 = vsub.f32 %v1174_v47, %v1255_v54  ;;  %v2840_v50 = vsub.f32 %v2134_v59, %v1255_v54  ;;  %v2842_v6 = vsub.f32 %v2135_v62, %v1255_v54  ;;  %v2844_v9 = vpop.f32.mrb[40].mxu1 }
 0x538   : > { %2988 = vst [vmem:[#allocation9_spill] sm:$0xff] %v2844_v9  ;;  %v1260_v8 = vsub.f32 %v1187_v0, %v1255_v54  ;;  %v1261_v43 = vsub.f32 %v1190_v5, %v1255_v54  ;;  %v1262_v12 = vsub.f32 %v2138_v49, %v1255_v54  ;;  %v1263_v16 = vsub.f32 %v2139_v4, %v1255_v54  ;;  %v2846_v20 = vpop.f32.mrb[41].mxu1 }
 0x539   : > { %2989 = vst [vmem:[#allocation10_spill] sm:$0xff] %v2846_v20  ;;  %v2848_v13 = vsub.f32 %v1203_v10, %v1255_v54  ;;  %v1265_v17 = vsub.f32 %v1206_v30, %v1255_v54  ;;  %v1266_v26 = vsub.f32 %v2142_v11, %v1255_v54  ;;  %v1267_v60 = vsub.f32 %v2143_v3, %v1255_v54  ;;  %v2850_v29 = vpop.f32.mrb[42].mxu1 }
 0x53a   : > { %2990 = vst [vmem:[#allocation11_spill] sm:$0xff] %v2850_v29  ;;  %v1268_v47 = vsub.f32 %v1219_v14, %v1255_v54  ;;  %v1269_v59 = vsub.f32 %v1222_v25, %v1255_v54  ;;  %v1270_v31 = vsub.f32 %v2146_v21, %v1255_v54  ;;  %v1271_v62 = vsub.f32 %v2147_v24, %v1255_v54  ;;  %v2852_v34 = vpop.f32.mrb[43].mxu1 }
 0x53b   : > { %2991 = vst [vmem:[#allocation12_spill] sm:$0xff] %v2852_v34  ;;  %v1272_v0 = vmul.f32 %v2836_v48, %v2836_v48  ;;  %v1273_v49 = vmul.f32 %v2838_v63, %v2838_v63  ;;  %v1274_v4 = vmul.f32 %v2840_v50, %v2840_v50  ;;  %v1275_v11 = vmul.f32 %v2842_v6, %v2842_v6 }
 0x53c   : > { %v1276_v3 = vmul.f32 %v1260_v8, %v1260_v8  ;;  %v1277_v21 = vmul.f32 %v1261_v43, %v1261_v43  ;;  %v1278_v24 = vmul.f32 %v1262_v12, %v1262_v12  ;;  %v1279_v45 = vmul.f32 %v1263_v16, %v1263_v16 }
 0x53d   : > { %v1288_v5 = vadd.f32 %v1273_v49, %v1272_v0  ;;  %v1280_v55 = vmul.f32 %v2848_v13, %v2848_v13  ;;  %v1281_v53 = vmul.f32 %v1265_v17, %v1265_v17  ;;  %v1282_v34 = vmul.f32 %v1266_v26, %v1266_v26 }
 0x53e   : > { %v1283_v49 = vmul.f32 %v1267_v60, %v1267_v60  ;;  %v1284_v20 = vmul.f32 %v1268_v47, %v1268_v47 }
 0x53f   : > { %v1289_v10 = vadd.f32 %v1288_v5, %v1274_v4  ;;  %v1285_v5 = vmul.f32 %v1269_v59, %v1269_v59 }
 0x541   : > { %v1290_v30 = vadd.f32 %v1289_v10, %v1275_v11  ;;  %v1286_v10 = vmul.f32 %v1270_v31, %v1270_v31 }
 0x543   : > { %v1291_v14 = vadd.f32 %v1290_v30, %v1276_v3  ;;  %v1287_v30 = vmul.f32 %v1271_v62, %v1271_v62 }
 0x545   : > { %v1292_v25 = vadd.f32 %v1291_v14, %v1277_v21 }
 0x547   : > { %v1293_v15 = vadd.f32 %v1292_v25, %v1278_v24 }
 0x549   : > { %v1294_v27 = vadd.f32 %v1293_v15, %v1279_v45 }
 0x54b   : > { %v1295_v54 = vadd.f32 %v1294_v27, %v1280_v55 }
 0x54d   : > { %v1296_v0 = vadd.f32 %v1295_v54, %v1281_v53 }
 0x54f   : > { %v1297_v29 = vadd.f32 %v1296_v0, %v1282_v34 }
 0x551   : > { %v1298_v4 = vadd.f32 %v1297_v29, %v1283_v49 }
 0x553   : > { %v1299_v11 = vadd.f32 %v1298_v4, %v1284_v20 }
 0x555   : > { %v1300_v3 = vadd.f32 %v1299_v11, %v1285_v5 }
 0x557   : > { %v1301_v21 = vadd.f32 %v1300_v3, %v1286_v10 }
 0x559   : > { %v1302_v14 = vadd.f32 %v1301_v21, %v1287_v30 }
 0x55b   : > { %v1303_v24 = vrot.slane %v1302_v14, 4 }
 0x55d   : > { %v1304_v25 = vadd.f32 %v1303_v24, %v1302_v14 }
 0x55f   : > { %v1305_v9 = vrot.slane %v1304_v25, 2 }
 0x561   : > { %v1306_v42 = vadd.f32 %v1305_v9, %v1304_v25 }
 0x563   : > { %v1307_v45 = vrot.slane %v1306_v42, 1 }
 0x565   : > { %v1308_v15 = vadd.f32 %v1307_v45, %v1306_v42 }
 0x567   : > { %v1309_v55 = vmul.f32 0.0078125, %v1308_v15 }
 0x569   : > { %v1310_v27 = vadd.f32 1e-05, %v1309_v55 }
 0x56b   : > { %2355 = vrsqrt.f32 %v1310_v27 }
 0x575   : > { %v2356_v53 = vpop.eup %2355 }
 0x576   : > { %v1316_v34 = vmul.f32 %v2356_v53, %v1260_v8  ;;  %v1317_v54 = vmul.f32 %v2356_v53, %v1261_v43  ;;  %v1318_v29 = vmul.f32 %v2356_v53, %v1262_v12  ;;  %v1319_v0 = vmul.f32 %v2356_v53, %v1263_v16 }
 0x577   : > { %v1321_v20 = vmul.f32 %v2356_v53, %v1265_v17  ;;  %v1322_v49 = vmul.f32 %v2356_v53, %v1266_v26  ;;  %v1323_v4 = vmul.f32 %v2356_v53, %v1267_v60  ;;  %v1324_v5 = vmul.f32 %v2356_v53, %v1268_v47 }
 0x578   : > { %v1325_v11 = vmul.f32 %v2356_v53, %v1269_v59  ;;  %v1326_v10 = vmul.f32 %v2356_v53, %v1270_v31  ;;  %v1327_v3 = vmul.f32 %v2356_v53, %v1271_v62  ;;  %v1332_v30 = vmax.f32 %v1316_v34, 0.0 }
 0x579   : > { %v1333_v21 = vmax.f32 %v1317_v54, 0.0  ;;  %v1334_v9 = vmax.f32 %v1318_v29, 0.0  ;;  %v1335_v14 = vmax.f32 %v1319_v0, 0.0  ;;  %v1338_v42 = vmax.f32 %v1322_v49, 0.0 }
 0x57a   : > { %v1339_v24 = vmax.f32 %v1323_v4, 0.0  ;;  %v1340_v25 = vmax.f32 %v1324_v5, 0.0  ;;  %v1341_v45 = vmax.f32 %v1325_v11, 0.0  ;;  %v1342_v15 = vmax.f32 %v1326_v10, 0.0 }
 0x57b   : > { %v1343_v8 = vmax.f32 %v1327_v3, 0.0  ;;  %v1346_v43 = vpack.c.bf16 %v1333_v21, %v1332_v30  ;;  %v1347_v12 = vpack.c.bf16 %v1335_v14, %v1334_v9  ;;  %v1312_v16 = vmul.f32 %v2356_v53, %v2836_v48  ;;  %v2994_v9 = vld [vmem:[#allocation10_spill] sm:$0xff] }
 0x57c   : > { %v1350_v17 = vpack.c.bf16 %v1341_v45, %v1340_v25  ;;  %v1313_v26 = vmul.f32 %v2356_v53, %v2838_v63  ;;  %v1314_v60 = vmul.f32 %v2356_v53, %v2840_v50  ;;  %v1315_v47 = vmul.f32 %v2356_v53, %v2842_v6  ;;  %v2996_v25 = vld [vmem:[#allocation12_spill] sm:$0xff] }
 0x57d   : > { %v1351_v59 = vpack.c.bf16 %v1343_v8, %v1342_v15  ;;  %v1320_v31 = vmul.f32 %v2356_v53, %v2848_v13  ;;  %v1328_v62 = vmax.f32 %v1312_v16, 0.0  ;;  %v1337_v55 = vmax.f32 %v1321_v20, 0.0 }
 0x57e   : > { %v1354_v27 = vmax.bf16 %v1350_v17, %v1346_v43  ;;  %v1329_v34 = vmax.f32 %v1313_v26, 0.0  ;;  %v1330_v54 = vmax.f32 %v1314_v60, 0.0  ;;  %v1331_v29 = vmax.f32 %v1315_v47, 0.0 }
 0x57f   : > { %v1355_v0 = vmax.bf16 %v1351_v59, %v1347_v12  ;;  %v1336_v49 = vmax.f32 %v1320_v31, 0.0  ;;  %v1349_v4 = vpack.c.bf16 %v1339_v24, %v1338_v42  ;;  %v2995_v42 = vld [vmem:[#allocation11_spill] sm:$0xff] }
 0x580   : > { %v1344_v48 = vpack.c.bf16 %v1329_v34, %v1328_v62  ;;  %v1345_v5 = vpack.c.bf16 %v1331_v29, %v1330_v54 }
 0x581   : > { %v1357_v11 = vmax.bf16 %v1355_v0, %v1354_v27  ;;  %v1348_v63 = vpack.c.bf16 %v1337_v55, %v1336_v49  ;;  %v1934_v55 = vld [vmem:[%s2975_s3] ss:$0 sm:$0xff] }
 0x582   : > { %v1353_v10 = vmax.bf16 %v1349_v4, %v1345_v5 }
 0x583   : > { %v1352_v50 = vmax.bf16 %v1348_v63, %v1344_v48 }
 0x585   : > { %v1356_v3 = vmax.bf16 %v1353_v10, %v1352_v50 }
 0x587   : > { %v1358_v6 = vmax.bf16 %v1357_v11, %v1356_v3 }
 0x589   : > { %2165 = vmatmul.mubr.bf16.vlgmr.msra.gmra.mrb[32].mxu0 %v1358_v6 }
 0x58a   : > { %2170 = vmatprep.mubr.msk.bf16.mxu0 %vm362_vm4, %v2612_v36 }
 0x65c   : > { %v1475_v13 = vpop.f32.mrb[32].mxu0 }
 0x65d   : > { %v2166_v53 = vpop.f32.mrb[33].mxu0 }
 0x65e   : > { %v1478_v20 = vpop.f32.mrb[34].mxu0 }
 0x65f   : > { %v1482_v30 = vpack.c.bf16 %v1478_v20, %v1475_v13  ;;  %v2167_v21 = vpop.f32.mrb[35].mxu0 }
 0x661   : > { %2168 = vmatprep.subr.bf16.mxu0 %v1482_v30 }
 0x662   : > { %2169 = vmatpush3.bf16.msra.mxu0 %v1482_v30 }
 0x663   : > { %2186 = vmatprep.subr.bf16.mxu0 %v2734_v22 }
 0x665   : > { %2171 = vmatmul.mubr.msk.bf16.vlgmr.msra.gmra.mrb[36].mxu0 %vm362_vm4, %v2610_v35 }
 0x666   : > { %2174 = vmatprep.mubr.msk.bf16.mxu0 %vm362_vm4, %v2622_v41  ;;  %2187 = vmatpush3.bf16.msra.mxu0 %v2734_v22 }
 0x667   : > { %2188 = vmatprep.subr.bf16.mxu0 %v2772_v1 }
 0x66a   : > { %2189 = vmatpush3.bf16.msra.mxu0 %v2772_v1 }
 0x66b   : > { %2190 = vmatprep.subr.bf16.mxu0 %v2781_v37 }
 0x66d   : > { %2175 = vmatmul.mubr.msk.bf16.gmra.mrb[40].mxu0 %vm362_vm4, %v2630_v46 }
 0x66e   : > { %2178 = vmatprep.mubr.msk.bf16.mxu0 %vm362_vm4, %v2638_v51  ;;  %2191 = vmatpush3.bf16.msra.mxu0 %v2781_v37 }
 0x66f   : > { %2192 = vmatprep.subr.bf16.mxu0 %v2785_v23 }
 0x672   : > { %2193 = vmatpush3.bf16.msra.mxu0 %v2785_v23 }
 0x673   : > { %2194 = vmatprep.subr.bf16.mxu0 %v2789_v7 }
 0x675   : > { %2179 = vmatmul.mubr.msk.bf16.gmra.mrb[44].mxu0 %vm362_vm4, %v2646_v56 }
 0x676   : > { %2182 = vmatprep.mubr.msk.bf16.mxu0 %vm362_vm4, %v2654_v61  ;;  %2195 = vmatpush3.bf16.msra.mxu0 %v2789_v7 }
 0x677   : > { %2196 = vmatprep.subr.bf16.mxu0 %v2793_v52 }
 0x67a   : > { %2197 = vmatpush3.bf16.msra.mxu0 %v2793_v52  ;;  %v2992_v52 = vld [vmem:[#allocation8_spill] sm:$0xff] }
 0x67b   : > { %2198 = vmatprep.subr.bf16.mxu0 %v2797_v44 }
 0x67d   : > { %2183 = vmatmul.mubr.msk.bf16.gmra.mrb[48].mxu0 %vm362_vm4, %v2662_v2 }
 0x67e   : > { %2199 = vmatpush3.bf16.msra.mxu0 %v2797_v44  ;;  %2202 = vmatprep.mubr.bf16.mxu0 %v2671_v19 }
 0x67f   : > { %2200 = vmatprep.subr.bf16.mxu0 %v2801_v57 }
 0x682   : > { %2201 = vmatpush3.bf16.msra.mxu0 %v2801_v57 }
 0x685   : > { %2203 = vmatmul.mubr.bf16.vlgmr.msra.gmra.mrb[36].mxu0 %v2669_v18 }
 0x740   : > { %v2176_v35 = vpop.f32.mrb[40].mxu0 }
 0x741   : > { %v1687_v36 = vadd.f32 %v2820_v33, %v2176_v35  ;;  %v1533_v41 = vpop.f32.mrb[41].mxu0  ;;  %v2993_v33 = vld [vmem:[#allocation9_spill] sm:$0xff] }
 0x742   : > { %v1679_v46 = vadd.f32 %v2822_v32, %v1533_v41  ;;  %v2177_v51 = vpop.f32.mrb[42].mxu0 }
 0x743   : > { %v1690_v56 = vadd.f32 %v2824_v38, %v2177_v51  ;;  %v1536_v61 = vpop.f32.mrb[43].mxu0 }
 0x744   : > { %v1682_v2 = vadd.f32 %v2826_v39, %v1536_v61 }
 0x748   : > { %v2180_v22 = vpop.f32.mrb[44].mxu0 }
 0x749   : > { %v1703_v19 = vadd.f32 %v2828_v58, %v2180_v22  ;;  %v1549_v1 = vpop.f32.mrb[45].mxu0 }
 0x74a   : > { %v1695_v37 = vadd.f32 %v2830_v28, %v1549_v1  ;;  %v2181_v18 = vpop.f32.mrb[46].mxu0 }
 0x74b   : > { %v1706_v23 = vadd.f32 %v2832_v40, %v2181_v18  ;;  %v1552_v7 = vpop.f32.mrb[47].mxu0 }
 0x74c   : > { %v1698_v44 = vadd.f32 %v2992_v52, %v1552_v7 }
 0x750   : > { %v2184_v57 = vpop.f32.mrb[48].mxu0 }
 0x751   : > { %v1719_v32 = vadd.f32 %v2993_v33, %v2184_v57  ;;  %v1565_v38 = vpop.f32.mrb[49].mxu0 }
 0x752   : > { %v1711_v39 = vadd.f32 %v2994_v9, %v1565_v38  ;;  %v2185_v14 = vpop.f32.mrb[50].mxu0 }
 0x753   : > { %v1722_v24 = vadd.f32 %v2995_v42, %v2185_v14  ;;  %v1568_v58 = vpop.f32.mrb[51].mxu0 }
 0x754   : > { %v1714_v45 = vadd.f32 %v2996_v25, %v1568_v58 }
 0x758   : > { %v2204_v28 = vpop.f32.mrb[36].mxu0 }
 0x759   : > { %v1726_v15 = vmax.f32 %v2204_v28, %v1687_v36  ;;  %v1662_v8 = vpop.f32.mrb[37].mxu0 }
 0x75a   : > { %v1725_v40 = vmax.f32 %v1662_v8, %v1679_v46  ;;  %v2205_v43 = vpop.f32.mrb[38].mxu0 }
 0x75b   : > { %v1728_v12 = vmax.f32 %v1726_v15, %v1703_v19  ;;  %v1733_v16 = vmax.f32 %v2205_v43, %v1690_v56  ;;  %v1665_v17 = vpop.f32.mrb[39].mxu0 }
 0x75c   : > { %v1727_v26 = vmax.f32 %v1725_v40, %v1695_v37  ;;  %v1732_v60 = vmax.f32 %v1665_v17, %v1682_v2 }
 0x75d   : > { %v1730_v47 = vmax.f32 %v1728_v12, %v1719_v32  ;;  %v1735_v59 = vmax.f32 %v1733_v16, %v1706_v23 }
 0x75e   : > { %v1729_v31 = vmax.f32 %v1727_v26, %v1711_v39  ;;  %v1734_v62 = vmax.f32 %v1732_v60, %v1698_v44 }
 0x75f   : > { %v1737_v27 = vmax.f32 %v1735_v59, %v1722_v24 }
 0x760   : > { %v1731_v34 = vmax.f32 %v1729_v31, %v1730_v47  ;;  %v1736_v54 = vmax.f32 %v1734_v62, %v1714_v45 }
 0x762   : > { %v1746_v29 = vadd.f32 %v1934_v55, %v1731_v34  ;;  %v1738_v0 = vmax.f32 %v1736_v54, %v1737_v27 }
 0x764   : > { %1748 = vst [vmem:[%s220_s14] sm:$0xff] %v1746_v29  ;;  %v1747_v49 = vadd.f32 %v1934_v55, %v1738_v0 }
 0x766   : > { %1749 = vst [vmem:[%s220_s14 + $0x8] sm:$0xff] %v1747_v49 }
 0x767   : > { %2398 = shalt.err (!%p2395_p7)
}
 0x768   : > { %s2399_s6 = scalar_lea.hbm %s2925_s28, 256  ;;  %s2403_s9 = scalar_lea.hbm %s2976_s4, 512 }
 0x769   : > { %p2400_p8 = scmp.ne.s32.totalorder %s2925_s28, %s2399_s6  ;;  %p2404_p1 = scmp.lt.u32.totalorder %s2925_s28, %s2976_s4 }
 0x76a   : > { %p2405_p0 = scmp.lt.u32.totalorder %s2403_s9, %s2399_s6  ;;  %p2407_p6 = scmp.lt.u32.totalorder %s2399_s6, %s2925_s28 }
 0x76b   : > { %p2401_p11 = pnand %p2400_p8, %p2997_p9 }
 0x76c   : > { %p2406_p5 = por %p2405_p0, %p2404_p1 }
 0x76d   : > { %p2402_p13 = pneg %p2401_p11 }
 0x76e   : > { %p2408_p10 = por %p2407_p6, %p2406_p5 }
 0x770   : > { %p2409_p12 = pnand %p2408_p10, %p2402_p13 }
 0x772   : > { %2412 = shalt.err (!%p2409_p12)
}
 0x773   : > { %s2460_s12 = smov 128   ;;  %s2461_s13 = smov 8  }
 0x774   : > { %2254 = dma.vmem_to_hbm [thread:$0]  (%p2997_p9), %s2927_s20, 256, %s2925_s28, %s2931_s30, %s2460_s12, %s2460_s12, %s2461_s13  }
 0x775 PF: > { %p2266_p2 = scmp.ge.s32.totalorder %s2451_s18, 2  ;;  %s1779_s14 = sand.u32 1, %s2439_s15  }
 0x776   : > { %p2998_p3 = scmp.ne.s32.totalorder %s2981_s26, 0  ;;  %s1780_s22 = scalar_lea.sflag [#allocation4], %s1779_s14 }
 0x778   : > { %p2261_p4 = pnand %p2266_p2, %p2998_p3 }
 0x77a   : > { %2434 = dma.done.wait (!%p2261_p4), %s1780_s22, 256  }
 0x77b   : > { %2436 = vsyncadd (!%p2261_p4), %s1780_s22, 4294967040  ;;  %p15_p7 = scmp.ge.s32.totalorder %s2512_s21, 4   ;;  %s2999_s15 = smov %s2443_s16 }
 0x77c   : > { %s3000_s16 = smov %s2447_s17  ;;  %s3001_s17 = smov %s2523_s24 }
 0x77d   : > { %s3002_s18 = smov %s2512_s21  ;;  %17 = sbr.rel (!%p15_p7) target bundleno = 4 (0x4), region = 83 }
 0x784   :  { %1785 = vsyncpa [#allocation3], 1 }
 0x785   :  { %1787 = vsyncpa [#allocation3 + $0x1], 1 }
 0x786   :  { %1788 = vsyncpa [#allocation4], 1 }
 0x787   :  { %1790 = vsyncpa [#allocation4 + $0x1], 1 }

</bundles_post_ra>
